<compile_context>
chip_gen: v7x
topology: tpu7x:2x2x1
jax: 0.10.0
libtpu: 0.0.40
codegen_flags: <defaults>
</compile_context>

<pallas_src>
import jax
import jax.numpy as jnp
from jax.experimental import pallas as pl
from jax.experimental.pallas import tpu as pltpu

N, C, H, W = 2, 4, 16, 16          # batch, filters, spatial
K = 3                              # kernel size ('same' padding, stride 1)
PAD = K // 2
EPS = 1e-5                         # nn.BatchNorm2d default eps
NHW = N * H * W                    # 512 -- lane-dense flat spatial axis
W_SHIFT = W.bit_length() - 1       # log2(W); H, W are powers of two
OFF = 128                          # interior offset inside the shift buffer
SHW = OFF + NHW + OFF              # shift-buffer width (covers +/-(W+1) taps)


def _residual_fused_kernel(x_ref, w1_ref, b1_ref, gamma_ref, beta_ref,
                           w2_ref, b2_ref, out_ref, conv2_ref,
                           xsh_ref, im2col_ref):
    x = x_ref[...]                                     # (C, NHW) f32

    # Module's actual return value: relu(x + skip_connection) with skip = x.
    out_ref[...] = jnp.maximum(x + x, 0.0)

    # Per-lane (h, w) coordinates of the flat N*H*W axis (computed once,
    # reused by both convs). Bit ops since H, W are powers of two.
    col = jax.lax.broadcasted_iota(jnp.int32, (C, NHW), 1)
    w_idx = jnp.bitwise_and(col, W - 1)                # col % W
    h_idx = jnp.bitwise_and(col >> W_SHIFT, H - 1)     # (col // W) % H

    taps = []                                          # 9 x (flat shift, validity)
    for kh in range(K):
        for kw in range(K):
            dh, dw = kh - PAD, kw - PAD
            valid = ((h_idx + dh >= 0) & (h_idx + dh < H) &
                     (w_idx + dw >= 0) & (w_idx + dw < W))
            taps.append((dh * W + dw, valid))

    # Keep the halo of the shift buffer deterministic (reads there are masked
    # by `valid` anyway).
    xsh_ref[...] = jnp.zeros((C, SHW), jnp.float32)

    def conv3x3_same(w_ref_, b_ref_):
        # im2col: 9 shifted+masked (C, NHW) slabs -> (K*K*C, NHW), one matmul.
        for t, (s, valid) in enumerate(taps):
            shifted = xsh_ref[:, OFF + s: OFF + s + NHW]
            im2col_ref[t * C:(t + 1) * C, :] = jnp.where(valid, shifted, 0.0)
        y = jnp.dot(w_ref_[...], im2col_ref[...],
                    preferred_element_type=jnp.float32)   # (C, NHW) on the MXU
        return y + b_ref_[...]                             # bias: (C,1) broadcast

    # ---- conv1 -> BatchNorm2d (training-mode batch stats) -> ReLU, in VMEM ----
    xsh_ref[:, OFF:OFF + NHW] = x
    y1 = conv3x3_same(w1_ref, b1_ref)
    inv = 1.0 / NHW
    m = jnp.sum(y1, axis=1, keepdims=True) * inv           # one-pass stats
    ms = jnp.sum(y1 * y1, axis=1, keepdims=True) * inv
    var = ms - m * m
    y1 = gamma_ref[...] * (y1 - m) * jax.lax.rsqrt(var + EPS) + beta_ref[...]
    act = jnp.maximum(y1, 0.0)

    # ---- conv2 on the activation (activation never touches HBM) ----
    xsh_ref[:, OFF:OFF + NHW] = act
    conv2_ref[...] = conv3x3_same(w2_ref, b2_ref)


@jax.jit
def residual_layer_forward(x, params):
    """Returns (module_output, conv2_output); module_output matches PyTorch forward."""
    w1, b1, gamma, beta, w2, b2 = params

    # Lane-dense layout plumbing (tiny XLA reshapes/transposes, no pads).
    x_flat = x.transpose(1, 0, 2, 3).reshape(C, NHW)             # (C, N*H*W)
    # Weight matrix rows ordered to match im2col rows: r = (kh*K + kw)*C + ci.
    w1m = w1.transpose(0, 2, 3, 1).reshape(C, K * K * C)         # (C, 36)
    w2m = w2.transpose(0, 2, 3, 1).reshape(C, K * K * C)

    vmem = pl.BlockSpec(memory_space=pltpu.MemorySpace.VMEM)
    out_flat, conv2_flat = pl.pallas_call(
        _residual_fused_kernel,
        out_shape=(jax.ShapeDtypeStruct((C, NHW), jnp.float32),
                   jax.ShapeDtypeStruct((C, NHW), jnp.float32)),
        in_specs=[vmem] * 7,
        out_specs=(vmem, vmem),
        scratch_shapes=[pltpu.VMEM((C, SHW), jnp.float32),        # shift buffer
                        pltpu.VMEM((K * K * C, NHW), jnp.float32)],  # im2col
    )(x_flat, w1m, b1.reshape(C, 1), gamma.reshape(C, 1),
      beta.reshape(C, 1), w2m, b2.reshape(C, 1))

    out = out_flat.reshape(C, N, H, W).transpose(1, 0, 2, 3)
    conv2_out = conv2_flat.reshape(C, N, H, W).transpose(1, 0, 2, 3)
    return out, conv2_out


def _ref_forward(x, params):
    """Pure-JAX reference mirroring the PyTorch module (for verification)."""
    w1, b1, gamma, beta, w2, b2 = params
    dn = ('NCHW', 'OIHW', 'NCHW')
    y = jax.lax.conv_general_dilated(x, w1, (1, 1), 'SAME', dimension_numbers=dn)
    y = y + b1[None, :, None, None]
    m = jnp.mean(y, axis=(0, 2, 3), keepdims=True)
    v = jnp.mean((y - m) ** 2, axis=(0, 2, 3), keepdims=True)
    y = gamma[None, :, None, None] * (y - m) / jnp.sqrt(v + EPS) + beta[None, :, None, None]
    y = jnp.maximum(y, 0.0)
    y2 = jax.lax.conv_general_dilated(y, w2, (1, 1), 'SAME', dimension_numbers=dn)
    y2 = y2 + b2[None, :, None, None]
    out = jnp.maximum(x + x, 0.0)   # the module's actual return value
    return out, y2


def make_params(key):
    k1, k2, k3, k4 = jax.random.split(key, 4)
    fan_in = C * K * K
    bound = 1.0 / jnp.sqrt(fan_in)
    w1 = jax.random.uniform(k1, (C, C, K, K), jnp.float32, -bound, bound)
    b1 = jax.random.uniform(k2, (C,), jnp.float32, -bound, bound)
    w2 = jax.random.uniform(k3, (C, C, K, K), jnp.float32, -bound, bound)
    b2 = jax.random.uniform(k4, (C,), jnp.float32, -bound, bound)
    gamma = jnp.ones((C,), jnp.float32)    # BatchNorm2d default weight
    beta = jnp.zeros((C,), jnp.float32)    # BatchNorm2d default bias
    return (w1, b1, gamma, beta, w2, b2)


if __name__ == "__main__":
    key = jax.random.PRNGKey(0)
    kx, kp = jax.random.split(key)
    x = jax.random.normal(kx, (N, C, H, W), jnp.float32)
    params = make_params(kp)

    out, conv2_out = jax.block_until_ready(residual_layer_forward(x, params))
    ref_out, ref_conv2 = _ref_forward(x, params)

    assert jnp.allclose(out, ref_out, atol=1e-5), "module output mismatch"
    assert jnp.allclose(conv2_out, ref_conv2, atol=1e-3, rtol=1e-3), "conv branch mismatch"
    print("KERNEL_OK")
</pallas_src>

<mosaic_0001>
module attributes {stable_mosaic.version = 11 : i64} {
  func.func @_residual_fused_kernel(%arg0: memref<4x512xf32, #tpu.memory_space<vmem>>, %arg1: memref<4x36xf32, #tpu.memory_space<vmem>>, %arg2: memref<4x1xf32, #tpu.memory_space<vmem>>, %arg3: memref<4x1xf32, #tpu.memory_space<vmem>>, %arg4: memref<4x1xf32, #tpu.memory_space<vmem>>, %arg5: memref<4x36xf32, #tpu.memory_space<vmem>>, %arg6: memref<4x1xf32, #tpu.memory_space<vmem>>, %arg7: memref<4x512xf32, #tpu.memory_space<vmem>>, %arg8: memref<4x512xf32, #tpu.memory_space<vmem>>, %arg9: memref<4x768xf32, #tpu.memory_space<vmem>>, %arg10: memref<36x512xf32, #tpu.memory_space<vmem>>) attributes {dimension_semantics = [], scalar_prefetch = 0 : i64, scratch_operands = 2 : i64, tpu.core_type = #tpu.core_type<tc>} {
    %c0 = arith.constant 0 : index
    %c0_0 = arith.constant 0 : index
    %0 = vector.load %arg0[%c0, %c0_0] : memref<4x512xf32, #tpu.memory_space<vmem>>, vector<4x512xf32>
    %1 = arith.addf %0, %0 : vector<4x512xf32>
    %cst = arith.constant 0.000000e+00 : f32
    %2 = vector.broadcast %cst : f32 to vector<4x512xf32>
    %3 = arith.maximumf %1, %2 : vector<4x512xf32>
    %c0_1 = arith.constant 0 : index
    %c0_2 = arith.constant 0 : index
    %4 = vector.load %arg7[%c0_1, %c0_2] : memref<4x512xf32, #tpu.memory_space<vmem>>, vector<4x512xf32>
    tpu.vector_store %arg7[%c0_1, %c0_2], %3 {strides = array<i32>} : memref<4x512xf32, #tpu.memory_space<vmem>>, vector<4x512xf32>,
    %5 = tpu.iota {dimensions = array<i32: 1>} : vector<4x512xi32>
    %c15_i32 = arith.constant 15 : i32
    %6 = vector.broadcast %c15_i32 : i32 to vector<4x512xi32>
    %7 = arith.andi %5, %6 : vector<4x512xi32>
    %c4_i32 = arith.constant 4 : i32
    %8 = vector.broadcast %c4_i32 : i32 to vector<4x512xi32>
    %9 = arith.shrsi %5, %8 : vector<4x512xi32>
    %c15_i32_3 = arith.constant 15 : i32
    %10 = vector.broadcast %c15_i32_3 : i32 to vector<4x512xi32>
    %11 = arith.andi %9, %10 : vector<4x512xi32>
    %c-1_i32 = arith.constant -1 : i32
    %12 = vector.broadcast %c-1_i32 : i32 to vector<4x512xi32>
    %13 = arith.addi %11, %12 : vector<4x512xi32>
    %c0_i32 = arith.constant 0 : i32
    %14 = vector.broadcast %c0_i32 : i32 to vector<4x512xi32>
    %15 = arith.cmpi sge, %13, %14 : vector<4x512xi32>
    %c-1_i32_4 = arith.constant -1 : i32
    %16 = vector.broadcast %c-1_i32_4 : i32 to vector<4x512xi32>
    %17 = arith.addi %11, %16 : vector<4x512xi32>
    %c16_i32 = arith.constant 16 : i32
    %18 = vector.broadcast %c16_i32 : i32 to vector<4x512xi32>
    %19 = arith.cmpi slt, %17, %18 : vector<4x512xi32>
    %20 = arith.andi %15, %19 : vector<4x512xi1>
    %c-1_i32_5 = arith.constant -1 : i32
    %21 = vector.broadcast %c-1_i32_5 : i32 to vector<4x512xi32>
    %22 = arith.addi %7, %21 : vector<4x512xi32>
    %c0_i32_6 = arith.constant 0 : i32
    %23 = vector.broadcast %c0_i32_6 : i32 to vector<4x512xi32>
    %24 = arith.cmpi sge, %22, %23 : vector<4x512xi32>
    %25 = arith.andi %20, %24 : vector<4x512xi1>
    %c-1_i32_7 = arith.constant -1 : i32
    %26 = vector.broadcast %c-1_i32_7 : i32 to vector<4x512xi32>
    %27 = arith.addi %7, %26 : vector<4x512xi32>
    %c16_i32_8 = arith.constant 16 : i32
    %28 = vector.broadcast %c16_i32_8 : i32 to vector<4x512xi32>
    %29 = arith.cmpi slt, %27, %28 : vector<4x512xi32>
    %30 = arith.andi %25, %29 : vector<4x512xi1>
    %c-1_i32_9 = arith.constant -1 : i32
    %31 = vector.broadcast %c-1_i32_9 : i32 to vector<4x512xi32>
    %32 = arith.addi %11, %31 : vector<4x512xi32>
    %c0_i32_10 = arith.constant 0 : i32
    %33 = vector.broadcast %c0_i32_10 : i32 to vector<4x512xi32>
    %34 = arith.cmpi sge, %32, %33 : vector<4x512xi32>
    %c-1_i32_11 = arith.constant -1 : i32
    %35 = vector.broadcast %c-1_i32_11 : i32 to vector<4x512xi32>
    %36 = arith.addi %11, %35 : vector<4x512xi32>
    %c16_i32_12 = arith.constant 16 : i32
    %37 = vector.broadcast %c16_i32_12 : i32 to vector<4x512xi32>
    %38 = arith.cmpi slt, %36, %37 : vector<4x512xi32>
    %39 = arith.andi %34, %38 : vector<4x512xi1>
    %c0_i32_13 = arith.constant 0 : i32
    %40 = vector.broadcast %c0_i32_13 : i32 to vector<4x512xi32>
    %41 = arith.addi %7, %40 : vector<4x512xi32>
    %c0_i32_14 = arith.constant 0 : i32
    %42 = vector.broadcast %c0_i32_14 : i32 to vector<4x512xi32>
    %43 = arith.cmpi sge, %41, %42 : vector<4x512xi32>
    %44 = arith.andi %39, %43 : vector<4x512xi1>
    %c0_i32_15 = arith.constant 0 : i32
    %45 = vector.broadcast %c0_i32_15 : i32 to vector<4x512xi32>
    %46 = arith.addi %7, %45 : vector<4x512xi32>
    %c16_i32_16 = arith.constant 16 : i32
    %47 = vector.broadcast %c16_i32_16 : i32 to vector<4x512xi32>
    %48 = arith.cmpi slt, %46, %47 : vector<4x512xi32>
    %49 = arith.andi %44, %48 : vector<4x512xi1>
    %c-1_i32_17 = arith.constant -1 : i32
    %50 = vector.broadcast %c-1_i32_17 : i32 to vector<4x512xi32>
    %51 = arith.addi %11, %50 : vector<4x512xi32>
    %c0_i32_18 = arith.constant 0 : i32
    %52 = vector.broadcast %c0_i32_18 : i32 to vector<4x512xi32>
    %53 = arith.cmpi sge, %51, %52 : vector<4x512xi32>
    %c-1_i32_19 = arith.constant -1 : i32
    %54 = vector.broadcast %c-1_i32_19 : i32 to vector<4x512xi32>
    %55 = arith.addi %11, %54 : vector<4x512xi32>
    %c16_i32_20 = arith.constant 16 : i32
    %56 = vector.broadcast %c16_i32_20 : i32 to vector<4x512xi32>
    %57 = arith.cmpi slt, %55, %56 : vector<4x512xi32>
    %58 = arith.andi %53, %57 : vector<4x512xi1>
    %c1_i32 = arith.constant 1 : i32
    %59 = vector.broadcast %c1_i32 : i32 to vector<4x512xi32>
    %60 = arith.addi %7, %59 : vector<4x512xi32>
    %c0_i32_21 = arith.constant 0 : i32
    %61 = vector.broadcast %c0_i32_21 : i32 to vector<4x512xi32>
    %62 = arith.cmpi sge, %60, %61 : vector<4x512xi32>
    %63 = arith.andi %58, %62 : vector<4x512xi1>
    %c1_i32_22 = arith.constant 1 : i32
    %64 = vector.broadcast %c1_i32_22 : i32 to vector<4x512xi32>
    %65 = arith.addi %7, %64 : vector<4x512xi32>
    %c16_i32_23 = arith.constant 16 : i32
    %66 = vector.broadcast %c16_i32_23 : i32 to vector<4x512xi32>
    %67 = arith.cmpi slt, %65, %66 : vector<4x512xi32>
    %68 = arith.andi %63, %67 : vector<4x512xi1>
    %c0_i32_24 = arith.constant 0 : i32
    %69 = vector.broadcast %c0_i32_24 : i32 to vector<4x512xi32>
    %70 = arith.addi %11, %69 : vector<4x512xi32>
    %c0_i32_25 = arith.constant 0 : i32
    %71 = vector.broadcast %c0_i32_25 : i32 to vector<4x512xi32>
    %72 = arith.cmpi sge, %70, %71 : vector<4x512xi32>
    %c0_i32_26 = arith.constant 0 : i32
    %73 = vector.broadcast %c0_i32_26 : i32 to vector<4x512xi32>
    %74 = arith.addi %11, %73 : vector<4x512xi32>
    %c16_i32_27 = arith.constant 16 : i32
    %75 = vector.broadcast %c16_i32_27 : i32 to vector<4x512xi32>
    %76 = arith.cmpi slt, %74, %75 : vector<4x512xi32>
    %77 = arith.andi %72, %76 : vector<4x512xi1>
    %c-1_i32_28 = arith.constant -1 : i32
    %78 = vector.broadcast %c-1_i32_28 : i32 to vector<4x512xi32>
    %79 = arith.addi %7, %78 : vector<4x512xi32>
    %c0_i32_29 = arith.constant 0 : i32
    %80 = vector.broadcast %c0_i32_29 : i32 to vector<4x512xi32>
    %81 = arith.cmpi sge, %79, %80 : vector<4x512xi32>
    %82 = arith.andi %77, %81 : vector<4x512xi1>
    %c-1_i32_30 = arith.constant -1 : i32
    %83 = vector.broadcast %c-1_i32_30 : i32 to vector<4x512xi32>
    %84 = arith.addi %7, %83 : vector<4x512xi32>
    %c16_i32_31 = arith.constant 16 : i32
    %85 = vector.broadcast %c16_i32_31 : i32 to vector<4x512xi32>
    %86 = arith.cmpi slt, %84, %85 : vector<4x512xi32>
    %87 = arith.andi %82, %86 : vector<4x512xi1>
    %c0_i32_32 = arith.constant 0 : i32
    %88 = vector.broadcast %c0_i32_32 : i32 to vector<4x512xi32>
    %89 = arith.addi %11, %88 : vector<4x512xi32>
    %c0_i32_33 = arith.constant 0 : i32
    %90 = vector.broadcast %c0_i32_33 : i32 to vector<4x512xi32>
    %91 = arith.cmpi sge, %89, %90 : vector<4x512xi32>
    %c0_i32_34 = arith.constant 0 : i32
    %92 = vector.broadcast %c0_i32_34 : i32 to vector<4x512xi32>
    %93 = arith.addi %11, %92 : vector<4x512xi32>
    %c16_i32_35 = arith.constant 16 : i32
    %94 = vector.broadcast %c16_i32_35 : i32 to vector<4x512xi32>
    %95 = arith.cmpi slt, %93, %94 : vector<4x512xi32>
    %96 = arith.andi %91, %95 : vector<4x512xi1>
    %c0_i32_36 = arith.constant 0 : i32
    %97 = vector.broadcast %c0_i32_36 : i32 to vector<4x512xi32>
    %98 = arith.addi %7, %97 : vector<4x512xi32>
    %c0_i32_37 = arith.constant 0 : i32
    %99 = vector.broadcast %c0_i32_37 : i32 to vector<4x512xi32>
    %100 = arith.cmpi sge, %98, %99 : vector<4x512xi32>
    %101 = arith.andi %96, %100 : vector<4x512xi1>
    %c0_i32_38 = arith.constant 0 : i32
    %102 = vector.broadcast %c0_i32_38 : i32 to vector<4x512xi32>
    %103 = arith.addi %7, %102 : vector<4x512xi32>
    %c16_i32_39 = arith.constant 16 : i32
    %104 = vector.broadcast %c16_i32_39 : i32 to vector<4x512xi32>
    %105 = arith.cmpi slt, %103, %104 : vector<4x512xi32>
    %106 = arith.andi %101, %105 : vector<4x512xi1>
    %c0_i32_40 = arith.constant 0 : i32
    %107 = vector.broadcast %c0_i32_40 : i32 to vector<4x512xi32>
    %108 = arith.addi %11, %107 : vector<4x512xi32>
    %c0_i32_41 = arith.constant 0 : i32
    %109 = vector.broadcast %c0_i32_41 : i32 to vector<4x512xi32>
    %110 = arith.cmpi sge, %108, %109 : vector<4x512xi32>
    %c0_i32_42 = arith.constant 0 : i32
    %111 = vector.broadcast %c0_i32_42 : i32 to vector<4x512xi32>
    %112 = arith.addi %11, %111 : vector<4x512xi32>
    %c16_i32_43 = arith.constant 16 : i32
    %113 = vector.broadcast %c16_i32_43 : i32 to vector<4x512xi32>
    %114 = arith.cmpi slt, %112, %113 : vector<4x512xi32>
    %115 = arith.andi %110, %114 : vector<4x512xi1>
    %c1_i32_44 = arith.constant 1 : i32
    %116 = vector.broadcast %c1_i32_44 : i32 to vector<4x512xi32>
    %117 = arith.addi %7, %116 : vector<4x512xi32>
    %c0_i32_45 = arith.constant 0 : i32
    %118 = vector.broadcast %c0_i32_45 : i32 to vector<4x512xi32>
    %119 = arith.cmpi sge, %117, %118 : vector<4x512xi32>
    %120 = arith.andi %115, %119 : vector<4x512xi1>
    %c1_i32_46 = arith.constant 1 : i32
    %121 = vector.broadcast %c1_i32_46 : i32 to vector<4x512xi32>
    %122 = arith.addi %7, %121 : vector<4x512xi32>
    %c16_i32_47 = arith.constant 16 : i32
    %123 = vector.broadcast %c16_i32_47 : i32 to vector<4x512xi32>
    %124 = arith.cmpi slt, %122, %123 : vector<4x512xi32>
    %125 = arith.andi %120, %124 : vector<4x512xi1>
    %c1_i32_48 = arith.constant 1 : i32
    %126 = vector.broadcast %c1_i32_48 : i32 to vector<4x512xi32>
    %127 = arith.addi %11, %126 : vector<4x512xi32>
    %c0_i32_49 = arith.constant 0 : i32
    %128 = vector.broadcast %c0_i32_49 : i32 to vector<4x512xi32>
    %129 = arith.cmpi sge, %127, %128 : vector<4x512xi32>
    %c1_i32_50 = arith.constant 1 : i32
    %130 = vector.broadcast %c1_i32_50 : i32 to vector<4x512xi32>
    %131 = arith.addi %11, %130 : vector<4x512xi32>
    %c16_i32_51 = arith.constant 16 : i32
    %132 = vector.broadcast %c16_i32_51 : i32 to vector<4x512xi32>
    %133 = arith.cmpi slt, %131, %132 : vector<4x512xi32>
    %134 = arith.andi %129, %133 : vector<4x512xi1>
    %c-1_i32_52 = arith.constant -1 : i32
    %135 = vector.broadcast %c-1_i32_52 : i32 to vector<4x512xi32>
    %136 = arith.addi %7, %135 : vector<4x512xi32>
    %c0_i32_53 = arith.constant 0 : i32
    %137 = vector.broadcast %c0_i32_53 : i32 to vector<4x512xi32>
    %138 = arith.cmpi sge, %136, %137 : vector<4x512xi32>
    %139 = arith.andi %134, %138 : vector<4x512xi1>
    %c-1_i32_54 = arith.constant -1 : i32
    %140 = vector.broadcast %c-1_i32_54 : i32 to vector<4x512xi32>
    %141 = arith.addi %7, %140 : vector<4x512xi32>
    %c16_i32_55 = arith.constant 16 : i32
    %142 = vector.broadcast %c16_i32_55 : i32 to vector<4x512xi32>
    %143 = arith.cmpi slt, %141, %142 : vector<4x512xi32>
    %144 = arith.andi %139, %143 : vector<4x512xi1>
    %c1_i32_56 = arith.constant 1 : i32
    %145 = vector.broadcast %c1_i32_56 : i32 to vector<4x512xi32>
    %146 = arith.addi %11, %145 : vector<4x512xi32>
    %c0_i32_57 = arith.constant 0 : i32
    %147 = vector.broadcast %c0_i32_57 : i32 to vector<4x512xi32>
    %148 = arith.cmpi sge, %146, %147 : vector<4x512xi32>
    %c1_i32_58 = arith.constant 1 : i32
    %149 = vector.broadcast %c1_i32_58 : i32 to vector<4x512xi32>
    %150 = arith.addi %11, %149 : vector<4x512xi32>
    %c16_i32_59 = arith.constant 16 : i32
    %151 = vector.broadcast %c16_i32_59 : i32 to vector<4x512xi32>
    %152 = arith.cmpi slt, %150, %151 : vector<4x512xi32>
    %153 = arith.andi %148, %152 : vector<4x512xi1>
    %c0_i32_60 = arith.constant 0 : i32
    %154 = vector.broadcast %c0_i32_60 : i32 to vector<4x512xi32>
    %155 = arith.addi %7, %154 : vector<4x512xi32>
    %c0_i32_61 = arith.constant 0 : i32
    %156 = vector.broadcast %c0_i32_61 : i32 to vector<4x512xi32>
    %157 = arith.cmpi sge, %155, %156 : vector<4x512xi32>
    %158 = arith.andi %153, %157 : vector<4x512xi1>
    %c0_i32_62 = arith.constant 0 : i32
    %159 = vector.broadcast %c0_i32_62 : i32 to vector<4x512xi32>
    %160 = arith.addi %7, %159 : vector<4x512xi32>
    %c16_i32_63 = arith.constant 16 : i32
    %161 = vector.broadcast %c16_i32_63 : i32 to vector<4x512xi32>
    %162 = arith.cmpi slt, %160, %161 : vector<4x512xi32>
    %163 = arith.andi %158, %162 : vector<4x512xi1>
    %c1_i32_64 = arith.constant 1 : i32
    %164 = vector.broadcast %c1_i32_64 : i32 to vector<4x512xi32>
    %165 = arith.addi %11, %164 : vector<4x512xi32>
    %c0_i32_65 = arith.constant 0 : i32
    %166 = vector.broadcast %c0_i32_65 : i32 to vector<4x512xi32>
    %167 = arith.cmpi sge, %165, %166 : vector<4x512xi32>
    %c1_i32_66 = arith.constant 1 : i32
    %168 = vector.broadcast %c1_i32_66 : i32 to vector<4x512xi32>
    %169 = arith.addi %11, %168 : vector<4x512xi32>
    %c16_i32_67 = arith.constant 16 : i32
    %170 = vector.broadcast %c16_i32_67 : i32 to vector<4x512xi32>
    %171 = arith.cmpi slt, %169, %170 : vector<4x512xi32>
    %172 = arith.andi %167, %171 : vector<4x512xi1>
    %c1_i32_68 = arith.constant 1 : i32
    %173 = vector.broadcast %c1_i32_68 : i32 to vector<4x512xi32>
    %174 = arith.addi %7, %173 : vector<4x512xi32>
    %c0_i32_69 = arith.constant 0 : i32
    %175 = vector.broadcast %c0_i32_69 : i32 to vector<4x512xi32>
    %176 = arith.cmpi sge, %174, %175 : vector<4x512xi32>
    %177 = arith.andi %172, %176 : vector<4x512xi1>
    %c1_i32_70 = arith.constant 1 : i32
    %178 = vector.broadcast %c1_i32_70 : i32 to vector<4x512xi32>
    %179 = arith.addi %7, %178 : vector<4x512xi32>
    %c16_i32_71 = arith.constant 16 : i32
    %180 = vector.broadcast %c16_i32_71 : i32 to vector<4x512xi32>
    %181 = arith.cmpi slt, %179, %180 : vector<4x512xi32>
    %182 = arith.andi %177, %181 : vector<4x512xi1>
    %cst_72 = arith.constant 0.000000e+00 : f32
    %183 = vector.broadcast %cst_72 : f32 to vector<4x768xf32>
    %c0_73 = arith.constant 0 : index
    %c0_74 = arith.constant 0 : index
    %184 = vector.load %arg9[%c0_73, %c0_74] : memref<4x768xf32, #tpu.memory_space<vmem>>, vector<4x768xf32>
    tpu.vector_store %arg9[%c0_73, %c0_74], %183 {strides = array<i32>} : memref<4x768xf32, #tpu.memory_space<vmem>>, vector<4x768xf32>,
    %c0_75 = arith.constant 0 : index
    %c128 = arith.constant 128 : index
    %185 = vector.load %arg9[%c0_75, %c128] : memref<4x768xf32, #tpu.memory_space<vmem>>, vector<4x512xf32>
    tpu.vector_store %arg9[%c0_75, %c128], %0 {strides = array<i32>} : memref<4x768xf32, #tpu.memory_space<vmem>>, vector<4x512xf32>,
    %c0_76 = arith.constant 0 : index
    %c111 = arith.constant 111 : index
    %186 = vector.load %arg9[%c0_76, %c111] : memref<4x768xf32, #tpu.memory_space<vmem>>, vector<4x512xf32>
    %cst_77 = arith.constant 0.000000e+00 : f32
    %187 = vector.broadcast %cst_77 : f32 to vector<4x512xf32>
    %188 = arith.select %30, %186, %187 : vector<4x512xi1>, vector<4x512xf32>
    %c0_78 = arith.constant 0 : index
    %c0_79 = arith.constant 0 : index
    %189 = vector.load %arg10[%c0_78, %c0_79] : memref<36x512xf32, #tpu.memory_space<vmem>>, vector<4x512xf32>
    tpu.vector_store %arg10[%c0_78, %c0_79], %188 {strides = array<i32>} : memref<36x512xf32, #tpu.memory_space<vmem>>, vector<4x512xf32>,
    %c0_80 = arith.constant 0 : index
    %c112 = arith.constant 112 : index
    %190 = vector.load %arg9[%c0_80, %c112] : memref<4x768xf32, #tpu.memory_space<vmem>>, vector<4x512xf32>
    %cst_81 = arith.constant 0.000000e+00 : f32
    %191 = vector.broadcast %cst_81 : f32 to vector<4x512xf32>
    %192 = arith.select %49, %190, %191 : vector<4x512xi1>, vector<4x512xf32>
    %c4 = arith.constant 4 : index
    %c0_82 = arith.constant 0 : index
    %193 = vector.load %arg10[%c4, %c0_82] : memref<36x512xf32, #tpu.memory_space<vmem>>, vector<4x512xf32>
    tpu.vector_store %arg10[%c4, %c0_82], %192 {strides = array<i32>} : memref<36x512xf32, #tpu.memory_space<vmem>>, vector<4x512xf32>,
    %c0_83 = arith.constant 0 : index
    %c113 = arith.constant 113 : index
    %194 = vector.load %arg9[%c0_83, %c113] : memref<4x768xf32, #tpu.memory_space<vmem>>, vector<4x512xf32>
    %cst_84 = arith.constant 0.000000e+00 : f32
    %195 = vector.broadcast %cst_84 : f32 to vector<4x512xf32>
    %196 = arith.select %68, %194, %195 : vector<4x512xi1>, vector<4x512xf32>
    %c8 = arith.constant 8 : index
    %c0_85 = arith.constant 0 : index
    %197 = vector.load %arg10[%c8, %c0_85] : memref<36x512xf32, #tpu.memory_space<vmem>>, vector<4x512xf32>
    tpu.vector_store %arg10[%c8, %c0_85], %196 {strides = array<i32>} : memref<36x512xf32, #tpu.memory_space<vmem>>, vector<4x512xf32>,
    %c0_86 = arith.constant 0 : index
    %c127 = arith.constant 127 : index
    %198 = vector.load %arg9[%c0_86, %c127] : memref<4x768xf32, #tpu.memory_space<vmem>>, vector<4x512xf32>
    %cst_87 = arith.constant 0.000000e+00 : f32
    %199 = vector.broadcast %cst_87 : f32 to vector<4x512xf32>
    %200 = arith.select %87, %198, %199 : vector<4x512xi1>, vector<4x512xf32>
    %c12 = arith.constant 12 : index
    %c0_88 = arith.constant 0 : index
    %201 = vector.load %arg10[%c12, %c0_88] : memref<36x512xf32, #tpu.memory_space<vmem>>, vector<4x512xf32>
    tpu.vector_store %arg10[%c12, %c0_88], %200 {strides = array<i32>} : memref<36x512xf32, #tpu.memory_space<vmem>>, vector<4x512xf32>,
    %c0_89 = arith.constant 0 : index
    %c128_90 = arith.constant 128 : index
    %202 = vector.load %arg9[%c0_89, %c128_90] : memref<4x768xf32, #tpu.memory_space<vmem>>, vector<4x512xf32>
    %cst_91 = arith.constant 0.000000e+00 : f32
    %203 = vector.broadcast %cst_91 : f32 to vector<4x512xf32>
    %204 = arith.select %106, %202, %203 : vector<4x512xi1>, vector<4x512xf32>
    %c16 = arith.constant 16 : index
    %c0_92 = arith.constant 0 : index
    %205 = vector.load %arg10[%c16, %c0_92] : memref<36x512xf32, #tpu.memory_space<vmem>>, vector<4x512xf32>
    tpu.vector_store %arg10[%c16, %c0_92], %204 {strides = array<i32>} : memref<36x512xf32, #tpu.memory_space<vmem>>, vector<4x512xf32>,
    %c0_93 = arith.constant 0 : index
    %c129 = arith.constant 129 : index
    %206 = vector.load %arg9[%c0_93, %c129] : memref<4x768xf32, #tpu.memory_space<vmem>>, vector<4x512xf32>
    %cst_94 = arith.constant 0.000000e+00 : f32
    %207 = vector.broadcast %cst_94 : f32 to vector<4x512xf32>
    %208 = arith.select %125, %206, %207 : vector<4x512xi1>, vector<4x512xf32>
    %c20 = arith.constant 20 : index
    %c0_95 = arith.constant 0 : index
    %209 = vector.load %arg10[%c20, %c0_95] : memref<36x512xf32, #tpu.memory_space<vmem>>, vector<4x512xf32>
    tpu.vector_store %arg10[%c20, %c0_95], %208 {strides = array<i32>} : memref<36x512xf32, #tpu.memory_space<vmem>>, vector<4x512xf32>,
    %c0_96 = arith.constant 0 : index
    %c143 = arith.constant 143 : index
    %210 = vector.load %arg9[%c0_96, %c143] : memref<4x768xf32, #tpu.memory_space<vmem>>, vector<4x512xf32>
    %cst_97 = arith.constant 0.000000e+00 : f32
    %211 = vector.broadcast %cst_97 : f32 to vector<4x512xf32>
    %212 = arith.select %144, %210, %211 : vector<4x512xi1>, vector<4x512xf32>
    %c24 = arith.constant 24 : index
    %c0_98 = arith.constant 0 : index
    %213 = vector.load %arg10[%c24, %c0_98] : memref<36x512xf32, #tpu.memory_space<vmem>>, vector<4x512xf32>
    tpu.vector_store %arg10[%c24, %c0_98], %212 {strides = array<i32>} : memref<36x512xf32, #tpu.memory_space<vmem>>, vector<4x512xf32>,
    %c0_99 = arith.constant 0 : index
    %c144 = arith.constant 144 : index
    %214 = vector.load %arg9[%c0_99, %c144] : memref<4x768xf32, #tpu.memory_space<vmem>>, vector<4x512xf32>
    %cst_100 = arith.constant 0.000000e+00 : f32
    %215 = vector.broadcast %cst_100 : f32 to vector<4x512xf32>
    %216 = arith.select %163, %214, %215 : vector<4x512xi1>, vector<4x512xf32>
    %c28 = arith.constant 28 : index
    %c0_101 = arith.constant 0 : index
    %217 = vector.load %arg10[%c28, %c0_101] : memref<36x512xf32, #tpu.memory_space<vmem>>, vector<4x512xf32>
    tpu.vector_store %arg10[%c28, %c0_101], %216 {strides = array<i32>} : memref<36x512xf32, #tpu.memory_space<vmem>>, vector<4x512xf32>,
    %c0_102 = arith.constant 0 : index
    %c145 = arith.constant 145 : index
    %218 = vector.load %arg9[%c0_102, %c145] : memref<4x768xf32, #tpu.memory_space<vmem>>, vector<4x512xf32>
    %cst_103 = arith.constant 0.000000e+00 : f32
    %219 = vector.broadcast %cst_103 : f32 to vector<4x512xf32>
    %220 = arith.select %182, %218, %219 : vector<4x512xi1>, vector<4x512xf32>
    %c32 = arith.constant 32 : index
    %c0_104 = arith.constant 0 : index
    %221 = vector.load %arg10[%c32, %c0_104] : memref<36x512xf32, #tpu.memory_space<vmem>>, vector<4x512xf32>
    tpu.vector_store %arg10[%c32, %c0_104], %220 {strides = array<i32>} : memref<36x512xf32, #tpu.memory_space<vmem>>, vector<4x512xf32>,
    %c0_105 = arith.constant 0 : index
    %c0_106 = arith.constant 0 : index
    %222 = vector.load %arg1[%c0_105, %c0_106] : memref<4x36xf32, #tpu.memory_space<vmem>>, vector<4x36xf32>
    %c0_107 = arith.constant 0 : index
    %c0_108 = arith.constant 0 : index
    %223 = vector.load %arg10[%c0_107, %c0_108] : memref<36x512xf32, #tpu.memory_space<vmem>>, vector<36x512xf32>
    %cst_109 = arith.constant dense<0.000000e+00> : vector<4x512xf32>
    %224 = tpu.matmul %222, %223, %cst_109 {dimension_numbers = #tpu.dot_dimension_numbers<[1], [0], [0], [1], [0, 0, 1, 1], [], []>} : vector<4x36xf32>, vector<36x512xf32>, vector<4x512xf32> -> vector<4x512xf32>
    %c0_110 = arith.constant 0 : index
    %c0_111 = arith.constant 0 : index
    %225 = vector.load %arg2[%c0_110, %c0_111] : memref<4x1xf32, #tpu.memory_space<vmem>>, vector<4x1xf32>
    %226 = vector.broadcast %225 : vector<4x1xf32> to vector<4x512xf32>
    %227 = arith.addf %224, %226 : vector<4x512xf32>
    %cst_112 = arith.constant dense<0.000000e+00> : vector<4xf32>
    %228 = vector.multi_reduction <add>, %227, %cst_112 [1] : vector<4x512xf32> to vector<4xf32>
    %229 = vector.shape_cast %228 : vector<4xf32> to vector<4x1xf32>
    %cst_113 = arith.constant 0.001953125 : f32
    %230 = vector.broadcast %cst_113 : f32 to vector<4x1xf32>
    %231 = arith.mulf %229, %230 : vector<4x1xf32>
    %232 = arith.mulf %227, %227 : vector<4x512xf32>
    %cst_114 = arith.constant dense<0.000000e+00> : vector<4xf32>
    %233 = vector.multi_reduction <add>, %232, %cst_114 [1] : vector<4x512xf32> to vector<4xf32>
    %234 = vector.shape_cast %233 : vector<4xf32> to vector<4x1xf32>
    %cst_115 = arith.constant 0.001953125 : f32
    %235 = vector.broadcast %cst_115 : f32 to vector<4x1xf32>
    %236 = arith.mulf %234, %235 : vector<4x1xf32>
    %237 = arith.mulf %231, %231 : vector<4x1xf32>
    %238 = arith.subf %236, %237 : vector<4x1xf32>
    %c0_116 = arith.constant 0 : index
    %c0_117 = arith.constant 0 : index
    %239 = vector.load %arg3[%c0_116, %c0_117] : memref<4x1xf32, #tpu.memory_space<vmem>>, vector<4x1xf32>
    %240 = vector.broadcast %231 : vector<4x1xf32> to vector<4x512xf32>
    %241 = arith.subf %227, %240 : vector<4x512xf32>
    %242 = vector.broadcast %239 : vector<4x1xf32> to vector<4x512xf32>
    %243 = arith.mulf %242, %241 : vector<4x512xf32>
    %cst_118 = arith.constant 9.99999974E-6 : f32
    %244 = vector.broadcast %cst_118 : f32 to vector<4x1xf32>
    %245 = arith.addf %238, %244 : vector<4x1xf32>
    %246 = math.rsqrt %245 : vector<4x1xf32>
    %247 = vector.broadcast %246 : vector<4x1xf32> to vector<4x512xf32>
    %248 = arith.mulf %243, %247 : vector<4x512xf32>
    %c0_119 = arith.constant 0 : index
    %c0_120 = arith.constant 0 : index
    %249 = vector.load %arg4[%c0_119, %c0_120] : memref<4x1xf32, #tpu.memory_space<vmem>>, vector<4x1xf32>
    %250 = vector.broadcast %249 : vector<4x1xf32> to vector<4x512xf32>
    %251 = arith.addf %248, %250 : vector<4x512xf32>
    %cst_121 = arith.constant 0.000000e+00 : f32
    %252 = vector.broadcast %cst_121 : f32 to vector<4x512xf32>
    %253 = arith.maximumf %251, %252 : vector<4x512xf32>
    %c0_122 = arith.constant 0 : index
    %c128_123 = arith.constant 128 : index
    %254 = vector.load %arg9[%c0_122, %c128_123] : memref<4x768xf32, #tpu.memory_space<vmem>>, vector<4x512xf32>
    tpu.vector_store %arg9[%c0_122, %c128_123], %253 {strides = array<i32>} : memref<4x768xf32, #tpu.memory_space<vmem>>, vector<4x512xf32>,
    %c0_124 = arith.constant 0 : index
    %c111_125 = arith.constant 111 : index
    %255 = vector.load %arg9[%c0_124, %c111_125] : memref<4x768xf32, #tpu.memory_space<vmem>>, vector<4x512xf32>
    %cst_126 = arith.constant 0.000000e+00 : f32
    %256 = vector.broadcast %cst_126 : f32 to vector<4x512xf32>
    %257 = arith.select %30, %255, %256 : vector<4x512xi1>, vector<4x512xf32>
    %c0_127 = arith.constant 0 : index
    %c0_128 = arith.constant 0 : index
    %258 = vector.load %arg10[%c0_127, %c0_128] : memref<36x512xf32, #tpu.memory_space<vmem>>, vector<4x512xf32>
    tpu.vector_store %arg10[%c0_127, %c0_128], %257 {strides = array<i32>} : memref<36x512xf32, #tpu.memory_space<vmem>>, vector<4x512xf32>,
    %c0_129 = arith.constant 0 : index
    %c112_130 = arith.constant 112 : index
    %259 = vector.load %arg9[%c0_129, %c112_130] : memref<4x768xf32, #tpu.memory_space<vmem>>, vector<4x512xf32>
    %cst_131 = arith.constant 0.000000e+00 : f32
    %260 = vector.broadcast %cst_131 : f32 to vector<4x512xf32>
    %261 = arith.select %49, %259, %260 : vector<4x512xi1>, vector<4x512xf32>
    %c4_132 = arith.constant 4 : index
    %c0_133 = arith.constant 0 : index
    %262 = vector.load %arg10[%c4_132, %c0_133] : memref<36x512xf32, #tpu.memory_space<vmem>>, vector<4x512xf32>
    tpu.vector_store %arg10[%c4_132, %c0_133], %261 {strides = array<i32>} : memref<36x512xf32, #tpu.memory_space<vmem>>, vector<4x512xf32>,
    %c0_134 = arith.constant 0 : index
    %c113_135 = arith.constant 113 : index
    %263 = vector.load %arg9[%c0_134, %c113_135] : memref<4x768xf32, #tpu.memory_space<vmem>>, vector<4x512xf32>
    %cst_136 = arith.constant 0.000000e+00 : f32
    %264 = vector.broadcast %cst_136 : f32 to vector<4x512xf32>
    %265 = arith.select %68, %263, %264 : vector<4x512xi1>, vector<4x512xf32>
    %c8_137 = arith.constant 8 : index
    %c0_138 = arith.constant 0 : index
    %266 = vector.load %arg10[%c8_137, %c0_138] : memref<36x512xf32, #tpu.memory_space<vmem>>, vector<4x512xf32>
    tpu.vector_store %arg10[%c8_137, %c0_138], %265 {strides = array<i32>} : memref<36x512xf32, #tpu.memory_space<vmem>>, vector<4x512xf32>,
    %c0_139 = arith.constant 0 : index
    %c127_140 = arith.constant 127 : index
    %267 = vector.load %arg9[%c0_139, %c127_140] : memref<4x768xf32, #tpu.memory_space<vmem>>, vector<4x512xf32>
    %cst_141 = arith.constant 0.000000e+00 : f32
    %268 = vector.broadcast %cst_141 : f32 to vector<4x512xf32>
    %269 = arith.select %87, %267, %268 : vector<4x512xi1>, vector<4x512xf32>
    %c12_142 = arith.constant 12 : index
    %c0_143 = arith.constant 0 : index
    %270 = vector.load %arg10[%c12_142, %c0_143] : memref<36x512xf32, #tpu.memory_space<vmem>>, vector<4x512xf32>
    tpu.vector_store %arg10[%c12_142, %c0_143], %269 {strides = array<i32>} : memref<36x512xf32, #tpu.memory_space<vmem>>, vector<4x512xf32>,
    %c0_144 = arith.constant 0 : index
    %c128_145 = arith.constant 128 : index
    %271 = vector.load %arg9[%c0_144, %c128_145] : memref<4x768xf32, #tpu.memory_space<vmem>>, vector<4x512xf32>
    %cst_146 = arith.constant 0.000000e+00 : f32
    %272 = vector.broadcast %cst_146 : f32 to vector<4x512xf32>
    %273 = arith.select %106, %271, %272 : vector<4x512xi1>, vector<4x512xf32>
    %c16_147 = arith.constant 16 : index
    %c0_148 = arith.constant 0 : index
    %274 = vector.load %arg10[%c16_147, %c0_148] : memref<36x512xf32, #tpu.memory_space<vmem>>, vector<4x512xf32>
    tpu.vector_store %arg10[%c16_147, %c0_148], %273 {strides = array<i32>} : memref<36x512xf32, #tpu.memory_space<vmem>>, vector<4x512xf32>,
    %c0_149 = arith.constant 0 : index
    %c129_150 = arith.constant 129 : index
    %275 = vector.load %arg9[%c0_149, %c129_150] : memref<4x768xf32, #tpu.memory_space<vmem>>, vector<4x512xf32>
    %cst_151 = arith.constant 0.000000e+00 : f32
    %276 = vector.broadcast %cst_151 : f32 to vector<4x512xf32>
    %277 = arith.select %125, %275, %276 : vector<4x512xi1>, vector<4x512xf32>
    %c20_152 = arith.constant 20 : index
    %c0_153 = arith.constant 0 : index
    %278 = vector.load %arg10[%c20_152, %c0_153] : memref<36x512xf32, #tpu.memory_space<vmem>>, vector<4x512xf32>
    tpu.vector_store %arg10[%c20_152, %c0_153], %277 {strides = array<i32>} : memref<36x512xf32, #tpu.memory_space<vmem>>, vector<4x512xf32>,
    %c0_154 = arith.constant 0 : index
    %c143_155 = arith.constant 143 : index
    %279 = vector.load %arg9[%c0_154, %c143_155] : memref<4x768xf32, #tpu.memory_space<vmem>>, vector<4x512xf32>
    %cst_156 = arith.constant 0.000000e+00 : f32
    %280 = vector.broadcast %cst_156 : f32 to vector<4x512xf32>
    %281 = arith.select %144, %279, %280 : vector<4x512xi1>, vector<4x512xf32>
    %c24_157 = arith.constant 24 : index
    %c0_158 = arith.constant 0 : index
    %282 = vector.load %arg10[%c24_157, %c0_158] : memref<36x512xf32, #tpu.memory_space<vmem>>, vector<4x512xf32>
    tpu.vector_store %arg10[%c24_157, %c0_158], %281 {strides = array<i32>} : memref<36x512xf32, #tpu.memory_space<vmem>>, vector<4x512xf32>,
    %c0_159 = arith.constant 0 : index
    %c144_160 = arith.constant 144 : index
    %283 = vector.load %arg9[%c0_159, %c144_160] : memref<4x768xf32, #tpu.memory_space<vmem>>, vector<4x512xf32>
    %cst_161 = arith.constant 0.000000e+00 : f32
    %284 = vector.broadcast %cst_161 : f32 to vector<4x512xf32>
    %285 = arith.select %163, %283, %284 : vector<4x512xi1>, vector<4x512xf32>
    %c28_162 = arith.constant 28 : index
    %c0_163 = arith.constant 0 : index
    %286 = vector.load %arg10[%c28_162, %c0_163] : memref<36x512xf32, #tpu.memory_space<vmem>>, vector<4x512xf32>
    tpu.vector_store %arg10[%c28_162, %c0_163], %285 {strides = array<i32>} : memref<36x512xf32, #tpu.memory_space<vmem>>, vector<4x512xf32>,
    %c0_164 = arith.constant 0 : index
    %c145_165 = arith.constant 145 : index
    %287 = vector.load %arg9[%c0_164, %c145_165] : memref<4x768xf32, #tpu.memory_space<vmem>>, vector<4x512xf32>
    %cst_166 = arith.constant 0.000000e+00 : f32
    %288 = vector.broadcast %cst_166 : f32 to vector<4x512xf32>
    %289 = arith.select %182, %287, %288 : vector<4x512xi1>, vector<4x512xf32>
    %c32_167 = arith.constant 32 : index
    %c0_168 = arith.constant 0 : index
    %290 = vector.load %arg10[%c32_167, %c0_168] : memref<36x512xf32, #tpu.memory_space<vmem>>, vector<4x512xf32>
    tpu.vector_store %arg10[%c32_167, %c0_168], %289 {strides = array<i32>} : memref<36x512xf32, #tpu.memory_space<vmem>>, vector<4x512xf32>,
    %c0_169 = arith.constant 0 : index
    %c0_170 = arith.constant 0 : index
    %291 = vector.load %arg5[%c0_169, %c0_170] : memref<4x36xf32, #tpu.memory_space<vmem>>, vector<4x36xf32>
    %c0_171 = arith.constant 0 : index
    %c0_172 = arith.constant 0 : index
    %292 = vector.load %arg10[%c0_171, %c0_172] : memref<36x512xf32, #tpu.memory_space<vmem>>, vector<36x512xf32>
    %cst_173 = arith.constant dense<0.000000e+00> : vector<4x512xf32>
    %293 = tpu.matmul %291, %292, %cst_173 {dimension_numbers = #tpu.dot_dimension_numbers<[1], [0], [0], [1], [0, 0, 1, 1], [], []>} : vector<4x36xf32>, vector<36x512xf32>, vector<4x512xf32> -> vector<4x512xf32>
    %c0_174 = arith.constant 0 : index
    %c0_175 = arith.constant 0 : index
    %294 = vector.load %arg6[%c0_174, %c0_175] : memref<4x1xf32, #tpu.memory_space<vmem>>, vector<4x1xf32>
    %295 = vector.broadcast %294 : vector<4x1xf32> to vector<4x512xf32>
    %296 = arith.addf %293, %295 : vector<4x512xf32>
    %c0_176 = arith.constant 0 : index
    %c0_177 = arith.constant 0 : index
    %297 = vector.load %arg8[%c0_176, %c0_177] : memref<4x512xf32, #tpu.memory_space<vmem>>, vector<4x512xf32>
    tpu.vector_store %arg8[%c0_176, %c0_177], %296 {strides = array<i32>} : memref<4x512xf32, #tpu.memory_space<vmem>>, vector<4x512xf32>,
    return
  }
}

</mosaic_0001>

<bundles_post_ra>
// kernel: residual_layer_forward.1
= control target key start
LH: loop header
LB: loop body
LE: loop exit
PB: predicated region body
PF: predicated region fallthrough
CT: control target
= control target key end

     0   :  { %v36_v0 = vlaneseq  ;;  %v1410_v3 = vmov 0.0   ;;  %s1411_s12 = smov 1   ;;  %s1412_s13 = smov 16   ;;  %v1419_v42 = vmov 0   ;;  %v2262_v54 = vmov 0  ;;  %s2205_s0 = inlined_call_operand.vmem [shape: f32[4,512], index: 0, kind: input, shape index: {}]   ;;  %s2206_s7 = inlined_call_operand.vmem [shape: f32[4,512], index: 7, kind: output, shape index: {0}]   ;;  %s2207_s2 = inlined_call_operand.vmem [shape: f32[4,1], index: 2, kind: input, shape index: {}]   ;;  %s2208_s1 = inlined_call_operand.vmem [shape: f32[4,36], index: 1, kind: input, shape index: {}]   ;;  %s2209_s3 = inlined_call_operand.vmem [shape: f32[4,1], index: 3, kind: input, shape index: {}]   ;;  %s2210_s4 = inlined_call_operand.vmem [shape: f32[4,1], index: 4, kind: input, shape index: {}]   ;;  %s2211_s6 = inlined_call_operand.vmem [shape: f32[4,1], index: 6, kind: input, shape index: {}]   ;;  %s2212_s5 = inlined_call_operand.vmem [shape: f32[4,36], index: 5, kind: input, shape index: {}]   ;;  %s2213_s8 = inlined_call_operand.vmem [shape: f32[4,512], index: 8, kind: output, shape index: {1}]  }
   0x1   :  { %v1468_v1 = vld [vmem:[%s2205_s0] sm:$0xff]  ;;  %v1473_v2 = vld [vmem:[%s2205_s0 + $0x8] sm:$0xff]  ;;  %201 = vst [vmem:[#allocation2] sm:$0xff] %v1410_v3  ;;  %202 = vst [vmem:[#allocation2 + $0x8] sm:$0xff] %v1410_v3  ;;  %658 = vmatprep.mubr.f32.mxu0 %v1410_v3  ;;  %729 = vmatprep.mubr.f32.mxu1 %v1410_v3  ;;  %s1414_s14 = smov 15   ;;  %s1415_s15 = smov 127  }
   0x2   :  { %203 = vst [vmem:[#allocation2 + $0x10] sm:$0xff] %v1410_v3  ;;  %v31_v4 = vadd.f32 %v1473_v2, %v1473_v2  ;;  %204 = vst [vmem:[#allocation2 + $0x4] sm:$0xff] %v1468_v1  ;;  %v30_v5 = vadd.f32 %v1468_v1, %v1468_v1  ;;  %v1486_v6 = vand.u32 127, %v36_v0  ;;  %v1517_v18 = vcombine.high %v1468_v1, %v1468_v1  ;;  %s1416_s16 = smov 112   ;;  %s1417_s17 = smov 113  }
   0x3   :  { %205 = vst [vmem:[#allocation2 + $0xc] sm:$0xff] %v1473_v2  ;;  %v393_v29 = vcombine.high %v1473_v2, %v1473_v2  ;;  %s1418_s18 = smov 111   ;;  %1398 = vset.pattern.permute.xlu0 %v1419_v42  ;;  %v571_v43 = vld [vmem:[%s2207_s2] sm:$0xf]  ;;  %1399 = vset.pattern.permute.xlu1 %v1419_v42  ;;  %v2264_v55 = vmov 0  ;;  %v2266_v61 = vmov 0 }
   0x4   :  { %v33_v7 = vmax.f32 %v31_v4, 0.0  ;;  %v32_v8 = vmax.f32 %v30_v5, 0.0  ;;  %v1489_v9 = vadd.s32 128, %v1486_v6  ;;  %v45_v10 = vshra.s32 %v1486_v6, 4 }
   0x5   :  { %v1527_v21 = vadd.s32 256, %v1486_v6  ;;  %v1530_v22 = vadd.s32 384, %v1486_v6  ;;  %v41_v44 = vand.u32 15, %v1486_v6  ;;  %v2268_v0 = vmov 0 }
   0x6   :  { %35 = vst [vmem:[%s2206_s7 + $0x8] sm:$0xff] %v33_v7  ;;  %34 = vst [vmem:[%s2206_s7] sm:$0xff] %v32_v8  ;;  %v46_v11 = vshra.s32 %v1489_v9, 4  ;;  %v1501_v13 = vand.u32 15, %v45_v10  ;;  %s1413_s7 = smov 17   ;;  %v42_v46 = vand.u32 15, %v1489_v9  ;;  %v2270_v4 = vmov 0 }
   0x7   :  { %v47_v24 = vshra.s32 %v1527_v21, 4  ;;  %v48_v25 = vshra.s32 %v1530_v22, 4  ;;  %v1619_v50 = vadd.s32 4294967295, %v41_v44 }
   0x8   :  { %v1503_v14 = vand.u32 15, %v46_v11  ;;  %vm125_vm0 = vcmp.ge.s32.totalorder %v1501_v13, 0  ;;  %vm129_vm2 = vcmp.lt.s32.totalorder %v1501_v13, 16  ;;  %v53_v45 = vadd.s32 4294967295, %v1501_v13 }
   0x9   :  { %v323_v15 = vld [vmem:[#allocation2] sm:$0xff]  ;;  %vm1509_vm4 = vmand %vm125_vm0, %vm129_vm2  ;;  %v1541_v26 = vand.u32 15, %v47_v24  ;;  %v1543_v27 = vand.u32 15, %v48_v25  ;;  %v388_v38 = vld [vmem:[#allocation2 + $0x14] sm:$0xf]  ;;  %v1621_v51 = vadd.s32 4294967295, %v42_v46 }
   0xa   :  { %v324_v12 = vld [vmem:[#allocation2 + $0x8] sm:$0xff]  ;;  %vm126_vm1 = vcmp.ge.s32.totalorder %v1503_v14, 0  ;;  %vm130_vm3 = vcmp.lt.s32.totalorder %v1503_v14, 16  ;;  %v247_v17 = vcombine.high %v323_v15, %v323_v15  ;;  %v378_v19 = vsel %vm1509_vm4, %v1468_v1, 0.0  ;;  %v243_v34 = vld [vmem:[#allocation2 + $0x10] sm:$0xf] }
   0xb   :  { %335 = vrot.lane.b32.xlu1 %v324_v12, %s1411_s12  ;;  %253 = vrot.lane.b32.xlu0 %v324_v12, %s1412_s13  ;;  %vm1522_vm5 = vmand %vm126_vm1, %vm130_vm3  ;;  %382 = vst [vmem:[#allocation3 + $0x40] sm:$0xf] %v378_v19  ;;  %vm127_vm6 = vcmp.ge.s32.totalorder %v1541_v26, 0  ;;  %vm128_vm7 = vcmp.ge.s32.totalorder %v1543_v27, 0  ;;  %vm131_vm8 = vcmp.lt.s32.totalorder %v1541_v26, 16  ;;  %vm132_vm9 = vcmp.lt.s32.totalorder %v1543_v27, 16 }
   0xc   :  { %v379_v23 = vsel %vm1522_vm5, %v1517_v18, 0.0  ;;  %v248_v28 = vcombine.high %v324_v12, %v324_v12  ;;  %vm1553_vm10 = vmand %vm127_vm6, %vm131_vm8  ;;  %v325_v35 = vld [vmem:[#allocation2 + $0x10] sm:$0xf]  ;;  %v470_v39 = vld [vmem:[#allocation2 + $0x14] sm:$0xf]  ;;  %v54_v49 = vadd.s32 4294967295, %v1503_v14 }
   0xd   :  { %383 = vst [vmem:[#allocation3 + $0x48] sm:$0xf] %v379_v23  ;;  %vm1557_vm11 = vmand %vm128_vm7, %vm132_vm9  ;;  %v380_v32 = vsel %vm1553_vm10, %v1473_v2, 0.0  ;;  %v208_v36 = vld [vmem:[#allocation2 + $0x10] sm:$0xf]  ;;  %vm57_vm12 = vcmp.ge.s32.totalorder %v53_v45, 0 }
   0xe   :  { %v381_v33 = vsel %vm1557_vm11, %v393_v29, 0.0  ;;  %384 = vst [vmem:[#allocation3 + $0x50] sm:$0xf] %v380_v32  ;;  %v290_v37 = vld [vmem:[#allocation2 + $0x10] sm:$0xf]  ;;  %vm61_vm13 = vcmp.lt.s32.totalorder %v53_v45, 16 }
   0xf   :  { %331 = vrot.lane.b32.xlu1 %v323_v15, %s1411_s12  ;;  %249 = vrot.lane.b32.xlu0 %v323_v15, %s1412_s13  ;;  %385 = vst [vmem:[#allocation3 + $0x58] sm:$0xf] %v381_v33  ;;  %v435_v40 = vld [vmem:[#allocation2 + $0x14] sm:$0xf]  ;;  %vm58_vm14 = vcmp.ge.s32.totalorder %v54_v49, 0  ;;  %vm62_vm15 = vcmp.lt.s32.totalorder %v54_v49, 16  ;;  %vm1623_vm0 = vmand %vm57_vm12, %vm61_vm13 }
  0x10   :  { %v517_v41 = vld [vmem:[#allocation2 + $0x14] sm:$0xf]  ;;  %v2263_v54 = vsel %vm1623_vm0, 4294967295, %v2262_v54  ;;  %vm2218_vm1 = vcmask 130048   ;;  %vm2222_vm2 = vcmp.ge.s32.totalorder %v1619_v50, 0  ;;  %vm1628_vm3 = vmand %vm58_vm14, %vm62_vm15  ;;  %vm2214_vm6 = vcmp.ge.s32.totalorder %v1621_v51, 0 }
  0x11   :  { %v2265_v55 = vsel %vm1628_vm3, 4294967295, %v2264_v55  ;;  %v1635_v58 = vadd.s32 1, %v42_v46  ;;  %vm1644_vm7 = vmand %vm1509_vm4, %vm2222_vm2  ;;  %vm2215_vm9 = vcmask 7168   ;;  %vm2216_vm12 = vcmask 138240  }
  0x12   :  { %v2267_v61 = vsel %vm1644_vm7, 4294967295, %v2266_v61  ;;  %vm1656_vm8 = vmand %vm1522_vm5, %vm2214_vm6  ;;  %v55_v7 = vadd.s32 4294967295, %v1541_v26  ;;  %vm2220_vm15 = vcmask 121856   ;;  %v2272_v19 = vmov 0 }
  0x13   :  { %251 = vrot.lane.b32.xlu0 %v247_v17, %s1412_s13  ;;  %218 = vrot.lane.b32.xlu1 %v324_v12, %s1413_s7  ;;  %v2269_v0 = vsel %vm1656_vm8, 4294967295, %v2268_v0  ;;  %vm1664_vm13 = vmand %vm1628_vm3, %vm2214_vm6  ;;  %vm2217_vm14 = vcmp.lt.s32.totalorder %v1635_v58, 16  ;;  %v1689_v23 = vadd.s32 1, %v41_v44  ;;  %v43_v24 = vand.u32 15, %v1527_v21 }
  0x14   :  { %v2271_v4 = vsel %vm1664_vm13, 4294967295, %v2270_v4  ;;  %vm1685_vm6 = vmand %vm1628_vm3, %vm2217_vm14  ;;  %v44_v32 = vand.u32 15, %v1530_v22  ;;  %v2280_v45 = vmov 0  ;;  %v2298_v21 = vmov 0 }
  0x15   :  { %v2273_v19 = vsel %vm1685_vm6, 4294967295, %v2272_v19  ;;  %vm1704_vm14 = vmand %vm1623_vm0, %vm2222_vm2  ;;  %vm2278_vm2 = vcmask 130048   ;;  %v2301_v22 = vmov 0 }
  0x17   :  { %333 = vrot.lane.b32.xlu1 %v247_v17, %s1411_s12  ;;  %216 = vrot.lane.b32.xlu0 %v247_v17, %s1413_s7 }
  0x1b   :  { %300 = vrot.lane.b32.xlu1 %v324_v12, %s1414_s14  ;;  %298 = vrot.lane.b32.xlu0 %v247_v17, %s1414_s14 }
  0x1f   :  { %255 = vrot.lane.b32.xlu1 %v248_v28, %s1412_s13  ;;  %214 = vrot.lane.b32.xlu0 %v323_v15, %s1413_s7 }
  0x23   :  { %296 = vrot.lane.b32.xlu1 %v323_v15, %s1414_s14  ;;  %257 = vrot.lane.b32.xlu0 %v243_v34, %s1412_s13 }
  0x27   :  { %339 = vrot.lane.b32.xlu1 %v325_v35, %s1411_s12  ;;  %337 = vrot.lane.b32.xlu0 %v248_v28, %s1411_s12  ;;  %v2274_v35 = vmov 0 }
  0x28   :  { %v2275_v35 = vsel %vm1704_vm14, 4294967295, %v2274_v35 }
  0x2b   :  { %398 = vrot.lane.b32.xlu1 %v1473_v2, %s1415_s15  ;;  %396 = vrot.lane.b32.xlu0 %v1517_v18, %s1415_s15 }
  0x2f   :  { %480 = vrot.lane.b32.xlu1 %v1473_v2, %s1416_s16  ;;  %478 = vrot.lane.b32.xlu0 %v1517_v18, %s1416_s16 }
  0x33   :  { %222 = vrot.lane.b32.xlu1 %v208_v36, %s1413_s7  ;;  %220 = vrot.lane.b32.xlu0 %v248_v28, %s1413_s7 }
  0x37   :  { %304 = vrot.lane.b32.xlu1 %v290_v37, %s1414_s14  ;;  %302 = vrot.lane.b32.xlu0 %v248_v28, %s1414_s14  ;;  %v1715_v37 = vadd.s32 4294967295, %v43_v24 }
  0x3b   :  { %476 = vrot.lane.b32.xlu1 %v1468_v1, %s1416_s16  ;;  %394 = vrot.lane.b32.xlu0 %v1468_v1, %s1415_s15 }
  0x3f   :  { %445 = vrot.lane.b32.xlu1 %v1473_v2, %s1417_s17  ;;  %443 = vrot.lane.b32.xlu0 %v1517_v18, %s1417_s17 }
  0x43   :  { %402 = vrot.lane.b32.xlu1 %v388_v38, %s1415_s15  ;;  %400 = vrot.lane.b32.xlu0 %v393_v29, %s1415_s15 }
  0x47   :  { %482 = vrot.lane.b32.xlu1 %v393_v29, %s1416_s16  ;;  %441 = vrot.lane.b32.xlu0 %v1468_v1, %s1417_s17 }
  0x4b   :  { %447 = vrot.lane.b32.xlu1 %v393_v29, %s1417_s17  ;;  %484 = vrot.lane.b32.xlu0 %v470_v39, %s1416_s16 }
  0x4f   :  { %525 = vrot.lane.b32.xlu1 %v1517_v18, %s1418_s18  ;;  %449 = vrot.lane.b32.xlu0 %v435_v40, %s1417_s17  ;;  %v1719_v40 = vadd.s32 4294967295, %v44_v32 }
  0x53   :  { %523 = vrot.lane.b32.xlu1 %v1468_v1, %s1418_s18  ;;  %527 = vrot.lane.b32.xlu0 %v1473_v2, %s1418_s18 }
  0x57   :  { %531 = vrot.lane.b32.xlu1 %v517_v41, %s1418_s18  ;;  %529 = vrot.lane.b32.xlu0 %v393_v29, %s1418_s18  ;;  %v56_v29 = vadd.s32 4294967295, %v1543_v27 }
  0x5b   :  { %574 = vperm.xlu0 %1398, %v571_v43  }
  0x7d   :  { %v1614_v47 = vpop.permute.xlu1 %335  ;;  %v1616_v48 = vpop.permute.xlu0 %253 }
  0x81   :  { %v332_v52 = vpop.permute.xlu1 %331  ;;  %v250_v53 = vpop.permute.xlu0 %249 }
  0x85   :  { %v252_v56 = vpop.permute.xlu0 %251  ;;  %v1633_v57 = vpop.permute.xlu1 %218 }
  0x86   :  { %v260_v59 = vsel %vm2218_vm1, %v250_v53, %v252_v56  ;;  %v261_v60 = vsel %vm2218_vm1, %v252_v56, %v1616_v48 }
  0x87   :  { %v268_v62 = vsel %vm1623_vm0, %v260_v59, 0.0  ;;  %v269_v63 = vsel %vm1628_vm3, %v261_v60, 0.0  ;;  %vm2226_vm3 = vcmp.lt.s32.totalorder %v1689_v23, 16 }
  0x88   :  { %v276_v1 = vrot.slane %v268_v62, 4  ;;  %v277_v2 = vrot.slane %v269_v63, 4  ;;  %v2286_v62 = vmov 0 }
  0x89   :  { %v334_v5 = vpop.permute.xlu1 %333  ;;  %v217_v6 = vpop.permute.xlu0 %216 }
  0x8a   :  { %284 = vst [vmem:[#allocation3] sm:$0xf0] %v276_v1  ;;  %285 = vst [vmem:[#allocation3 + $0x8] sm:$0xf0] %v277_v2  ;;  %v342_v8 = vsel %vm2215_vm9, %v332_v52, %v334_v5  ;;  %v343_v9 = vsel %vm2215_vm9, %v334_v5, %v1614_v47  ;;  %v226_v10 = vsel %vm2216_vm12, %v217_v6, %v1633_v57  ;;  %vm59_vm9 = vcmp.ge.s32.totalorder %v55_v7, 0 }
  0x8b   :  { %v350_v11 = vsel %vm1644_vm7, %v342_v8, 0.0  ;;  %v351_v12 = vsel %vm1656_vm8, %v343_v9, 0.0  ;;  %v234_v15 = vsel %vm1664_vm13, %v226_v10, 0.0  ;;  %vm63_vm12 = vcmp.lt.s32.totalorder %v55_v7, 16 }
  0x8c   :  { %v358_v17 = vrot.slane %v350_v11, 4  ;;  %v359_v18 = vrot.slane %v351_v12, 4  ;;  %238 = vst [vmem:[#allocation3 + $0x8] sm:$0xf] %v234_v15  ;;  %vm1708_vm1 = vmand %vm59_vm9, %vm63_vm12  ;;  %vm2279_vm9 = vcmask 138240   ;;  %vm2285_vm8 = vcmask 130048  }
  0x8d   :  { %v1692_v25 = vpop.permute.xlu1 %300  ;;  %v299_v28 = vpop.permute.xlu0 %298  ;;  %vm1732_vm12 = vmand %vm1623_vm0, %vm2226_vm3  ;;  %v2288_v5 = vmov 0  ;;  %v162_v9 = vadd.s32 1, %v1503_v14  ;;  %vm2230_vm3 = vcmask 1039360   ;;  %v2293_v14 = vmov 0 }
  0x8e   :  { %366 = vst [vmem:[#allocation3 + $0x20] sm:$0xf0] %v358_v17  ;;  %367 = vst [vmem:[#allocation3 + $0x28] sm:$0xf0] %v359_v18  ;;  %v308_v33 = vsel %vm2220_vm15, %v299_v28, %v1692_v25  ;;  %vm60_vm15 = vcmp.ge.s32.totalorder %v56_v29, 0  ;;  %v2281_v45 = vsel %vm1732_vm12, 4294967295, %v2280_v45 }
  0x8f   :  { %v316_v34 = vsel %vm1685_vm6, %v308_v33, 0.0  ;;  %vm64_vm6 = vcmp.lt.s32.totalorder %v56_v29, 16  ;;  %vm2232_vm0 = vcmask 916480  }
  0x90   :  { %320 = vst [vmem:[#allocation3 + $0x28] sm:$0xf] %v316_v34  ;;  %vm1736_vm13 = vmand %vm60_vm15, %vm64_vm6 }
  0x91   :  { %v256_v38 = vpop.permute.xlu1 %255  ;;  %v215_v39 = vpop.permute.xlu0 %214 }
  0x92   :  { %v262_v41 = vsel %vm2278_vm2, %v1616_v48, %v256_v38  ;;  %v225_v42 = vsel %vm2279_vm9, %v215_v39, %v217_v6  ;;  %vm2228_vm2 = vcmp.ge.s32.totalorder %v1715_v37, 0  ;;  %vm2227_vm9 = vcmp.ge.s32.totalorder %v1719_v40, 0 }
  0x93   :  { %v270_v43 = vsel %vm1708_vm1, %v262_v41, 0.0  ;;  %v233_v44 = vsel %vm1704_vm14, %v225_v42, 0.0  ;;  %vm2284_vm14 = vcmask 121856   ;;  %vm1752_vm6 = vmand %vm1553_vm10, %vm2228_vm2  ;;  %v552_v63 = vld [vmem:[#allocation3 + $0x8] sm:$0xff] }
  0x94   :  { %v278_v46 = vrot.slane %v270_v43, 4  ;;  %237 = vst [vmem:[#allocation3] sm:$0xf] %v233_v44  ;;  %v2287_v62 = vsel %vm1752_vm6, 4294967295, %v2286_v62  ;;  %v1792_v43 = vadd.s32 1, %v43_v24 }
  0x95   :  { %v297_v49 = vpop.permute.xlu1 %296  ;;  %v258_v52 = vpop.permute.xlu0 %257 }
  0x96   :  { %286 = vst [vmem:[#allocation3 + $0x10] sm:$0xf0] %v278_v46  ;;  %v307_v53 = vsel %vm2284_vm14, %v297_v49, %v299_v28  ;;  %v263_v56 = vsel %vm2285_vm8, %v256_v38, %v258_v52  ;;  %vm1760_vm8 = vmand %vm1557_vm11, %vm2227_vm9  ;;  %vm2290_vm14 = vcmask 7168   ;;  %vm2292_vm9 = vcmp.lt.s32.totalorder %v1635_v58, 16 }
  0x97   :  { %v315_v59 = vsel %vm1732_vm12, %v307_v53, 0.0  ;;  %v271_v60 = vsel %vm1736_vm13, %v263_v56, 0.0  ;;  %v556_v1 = vld [vmem:[#allocation3 + $0x28] sm:$0xff]  ;;  %v2289_v5 = vsel %vm1760_vm8, 4294967295, %v2288_v5  ;;  %vm2291_vm15 = vmmov %vm2290_vm14  ;;  %v1798_v49 = vadd.s32 1, %v44_v32 }
  0x98   :  { %319 = vst [vmem:[#allocation3 + $0x20] sm:$0xf] %v315_v59  ;;  %v279_v2 = vrot.slane %v271_v60, 4  ;;  %v1356_v6 = vpack.c.bf16 %v556_v1, %v552_v63  ;;  %vm1776_vm2 = vmand %vm1522_vm5, %vm2292_vm9  ;;  %v161_v32 = vadd.s32 1, %v1501_v13  ;;  %vm2303_vm12 = vcmask 138240  }
  0x99   :  { %v340_v7 = vpop.permute.xlu1 %339  ;;  %v338_v8 = vpop.permute.xlu0 %337  ;;  %v2294_v14 = vsel %vm1776_vm2, 4294967295, %v2293_v14  ;;  %v2305_v13 = vmov 0 }
  0x9a   :  { %287 = vst [vmem:[#allocation3 + $0x18] sm:$0xf0] %v279_v2  ;;  %v344_v10 = vsel %vm2290_vm14, %v1614_v47, %v338_v8  ;;  %v345_v11 = vsel %vm2291_vm15, %v338_v8, %v340_v7  ;;  %1357 = vmatprep.subr.bf16.mxu0 %v1356_v6  ;;  %vm166_vm14 = vcmp.ge.s32.totalorder %v162_v9, 0  ;;  %vm170_vm15 = vcmp.lt.s32.totalorder %v162_v9, 16 }
  0x9b   :  { %v352_v12 = vsel %vm1752_vm6, %v344_v10, 0.0  ;;  %v353_v15 = vsel %vm1760_vm8, %v345_v11, 0.0  ;;  %v551_v34 = vld [vmem:[#allocation3] sm:$0xff]  ;;  %vm1786_vm9 = vmand %vm166_vm14, %vm170_vm15  ;;  %vm2297_vm14 = vcmp.ge.s32.totalorder %v1715_v37, 0 }
  0x9c   :  { %v360_v17 = vrot.slane %v352_v12, 4  ;;  %v361_v18 = vrot.slane %v353_v15, 4  ;;  %vm1808_vm15 = vmand %vm1708_vm1, %vm2297_vm14  ;;  %vm2239_vm14 = vcmp.lt.s32.totalorder %v1798_v49, 16 }
  0x9d   :  { %v1780_v47 = vpop.permute.xlu1 %398  ;;  %v397_v28 = vpop.permute.xlu0 %396  ;;  %v2299_v21 = vsel %vm1808_vm15, 4294967295, %v2298_v21  ;;  %vm2304_vm8 = vmmov %vm2303_vm12 }
  0x9e   :  { %368 = vst [vmem:[#allocation3 + $0x30] sm:$0xf0] %v360_v17  ;;  %369 = vst [vmem:[#allocation3 + $0x38] sm:$0xf0] %v361_v18  ;;  %v406_v29 = vsel %vm2230_vm3, %v397_v28, %v1780_v47  ;;  %vm2300_vm3 = vcmp.ge.s32.totalorder %v1719_v40, 0 }
  0x9f   :  { %v414_v33 = vsel %vm1776_vm2, %v406_v29, 0.0  ;;  %v555_v38 = vld [vmem:[#allocation3 + $0x20] sm:$0xff]  ;;  %vm1816_vm2 = vmand %vm1736_vm13, %vm2300_vm3 }
  0xa0   :  { %v422_v39 = vrot.slane %v414_v33, 4  ;;  %v1358_v42 = vpack.c.bf16 %v555_v38, %v551_v34  ;;  %v2302_v22 = vsel %vm1816_vm2, 4294967295, %v2301_v22 }
  0xa1   :  { %v1794_v44 = vpop.permute.xlu1 %480  ;;  %v479_v46 = vpop.permute.xlu0 %478 }
  0xa2   :  { %430 = vst [vmem:[#allocation3 + $0x48] sm:$0xf0] %v422_v39  ;;  %v488_v52 = vsel %vm2232_vm0, %v479_v46, %v1794_v44  ;;  %1359 = vmatpush1.bf16.msra.mxu0 %v1358_v42  ;;  %vm2237_vm0 = vcmp.lt.s32.totalorder %v1792_v43, 16  ;;  %v2319_v42 = vmov 0 }
  0xa3   :  { %v496_v53 = vsel %vm1786_vm9, %v488_v52, 0.0  ;;  %vm1834_vm3 = vmand %vm1708_vm1, %vm2237_vm0 }
  0xa4   :  { %v504_v24 = vrot.slane %v496_v53, 4  ;;  %v2306_v13 = vsel %vm1834_vm3, 4294967295, %v2305_v13 }
  0xa5   :  { %v223_v56 = vpop.permute.xlu1 %222  ;;  %v221_v59 = vpop.permute.xlu0 %220 }
  0xa6   :  { %512 = vst [vmem:[#allocation3 + $0x68] sm:$0xf0] %v504_v24  ;;  %v227_v60 = vsel %vm2303_vm12, %v1633_v57, %v221_v59  ;;  %v228_v63 = vsel %vm2304_vm8, %v221_v59, %v223_v56  ;;  %vm1842_vm12 = vmand %vm1736_vm13, %vm2239_vm14  ;;  %v2307_v57 = vmov 0  ;;  %vm165_vm8 = vcmp.ge.s32.totalorder %v161_v32, 0 }
  0xa7   :  { %v235_v1 = vsel %vm1808_vm15, %v227_v60, 0.0  ;;  %v236_v2 = vsel %vm1816_vm2, %v228_v63, 0.0  ;;  %v2308_v57 = vsel %vm1842_vm12, 4294967295, %v2307_v57  ;;  %vm169_vm2 = vcmp.lt.s32.totalorder %v161_v32, 16 }
  0xa8   :  { %239 = vst [vmem:[#allocation3 + $0x10] sm:$0xf] %v235_v1  ;;  %240 = vst [vmem:[#allocation3 + $0x18] sm:$0xf] %v236_v2  ;;  %vm2309_vm15 = vcmask 121856   ;;  %vm2313_vm14 = vcmp.lt.s32.totalorder %v1689_v23, 16 }
  0xa9   :  { %v305_v6 = vpop.permute.xlu1 %304  ;;  %v303_v7 = vpop.permute.xlu0 %302  ;;  %vm2310_vm0 = vmmov %vm2309_vm15  ;;  %v2325_v60 = vmov 0 }
  0xaa   :  { %v309_v8 = vsel %vm2309_vm15, %v1692_v25, %v303_v7  ;;  %v310_v9 = vsel %vm2310_vm0, %v303_v7, %v305_v6  ;;  %vm1853_vm6 = vmand %vm165_vm8, %vm169_vm2  ;;  %v2314_v25 = vmov 0  ;;  %vm2316_vm0 = vcmask 916480  }
  0xab   :  { %v317_v10 = vsel %vm1834_vm3, %v309_v8, 0.0  ;;  %v318_v11 = vsel %vm1842_vm12, %v310_v9, 0.0  ;;  %vm1861_vm7 = vmand %vm1509_vm4, %vm2313_vm14  ;;  %vm2317_vm15 = vcmask 1039360   ;;  %vm2241_vm2 = vcmask 924672  }
  0xac   :  { %321 = vst [vmem:[#allocation3 + $0x30] sm:$0xf] %v317_v10  ;;  %322 = vst [vmem:[#allocation3 + $0x38] sm:$0xf] %v318_v11  ;;  %v2315_v25 = vsel %vm1861_vm7, 4294967295, %v2314_v25  ;;  %vm2318_vm14 = vcmp.ge.s32.totalorder %v1621_v51, 0 }
  0xad   :  { %v477_v15 = vpop.permute.xlu1 %476  ;;  %v395_v17 = vpop.permute.xlu0 %394  ;;  %vm1875_vm8 = vmand %vm1786_vm9, %vm2318_vm14  ;;  %v2322_v51 = vmov 0  ;;  %vm2324_vm14 = vcmp.lt.s32.totalorder %v1798_v49, 16  ;;  %v164_v7 = vadd.s32 1, %v1543_v27  ;;  %vm2331_vm3 = vcmp.ge.s32.totalorder %v1619_v50, 0 }
  0xae   :  { %v487_v18 = vsel %vm2316_vm0, %v477_v15, %v479_v46  ;;  %v405_v29 = vsel %vm2317_vm15, %v395_v17, %v397_v28  ;;  %v2320_v42 = vsel %vm1875_vm8, 4294967295, %v2319_v42  ;;  %v163_v46 = vadd.s32 1, %v1541_v26 }
  0xaf   :  { %v495_v33 = vsel %vm1853_vm6, %v487_v18, 0.0  ;;  %v413_v34 = vsel %vm1861_vm7, %v405_v29, 0.0  ;;  %vm2321_vm0 = vcmp.lt.s32.totalorder %v1792_v43, 16  ;;  %v554_v24 = vld [vmem:[#allocation3 + $0x18] sm:$0xff]  ;;  %v553_v26 = vld [vmem:[#allocation3 + $0x10] sm:$0xff]  ;;  %v2332_v27 = vmov 0 }
  0xb0   :  { %v503_v38 = vrot.slane %v495_v33, 4  ;;  %v421_v39 = vrot.slane %v413_v34, 4  ;;  %vm1885_vm15 = vmand %vm1553_vm10, %vm2321_vm0  ;;  %vm167_vm0 = vcmp.ge.s32.totalorder %v163_v46, 0  ;;  %vm171_vm7 = vcmp.lt.s32.totalorder %v163_v46, 16  ;;  %v560_v46 = vld [vmem:[#allocation3 + $0x48] sm:$0xff] }
  0xb1   :  { %v446_v28 = vpop.permute.xlu1 %445  ;;  %v444_v52 = vpop.permute.xlu0 %443  ;;  %v2323_v51 = vsel %vm1885_vm15, 4294967295, %v2322_v51 }
  0xb2   :  { %511 = vst [vmem:[#allocation3 + $0x60] sm:$0xf0] %v503_v38  ;;  %429 = vst [vmem:[#allocation3 + $0x40] sm:$0xf0] %v421_v39  ;;  %v453_v53 = vsel %vm2241_vm2, %v444_v52, %v446_v28  ;;  %v2337_v39 = vmov 0 }
  0xb3   :  { %v461_v32 = vsel %vm1875_vm8, %v453_v53, 0.0  ;;  %v558_v56 = vld [vmem:[#allocation3 + $0x38] sm:$0xff]  ;;  %v557_v59 = vld [vmem:[#allocation3 + $0x30] sm:$0xff]  ;;  %vm1895_vm2 = vmand %vm1557_vm11, %vm2324_vm14  ;;  %vm2327_vm8 = vcmask 1039360  }
  0xb4   :  { %465 = vst [vmem:[#allocation3 + $0x68] sm:$0xf] %v461_v32  ;;  %v2326_v60 = vsel %vm1895_vm2, 4294967295, %v2325_v60  ;;  %v1364_v63 = vpack.c.bf16 %v558_v56, %v554_v24  ;;  %v1366_v1 = vpack.c.bf16 %v557_v59, %v553_v26  ;;  %vm2328_vm12 = vmmov %vm2327_vm8 }
  0xb5   :  { %v403_v2 = vpop.permute.xlu1 %402  ;;  %v401_v6 = vpop.permute.xlu0 %400  ;;  %vm1907_vm14 = vmand %vm167_vm0, %vm171_vm7  ;;  %vm2334_vm7 = vcmask 916480   ;;  %vm2335_vm0 = vcmask 924672  }
  0xb6   :  { %v407_v8 = vsel %vm2327_vm8, %v1780_v47, %v401_v6  ;;  %v408_v9 = vsel %vm2328_vm12, %v401_v6, %v403_v2  ;;  %1365 = vmatprep.subr.bf16.mxu1 %v1364_v63  ;;  %vm1915_vm8 = vmand %vm1853_vm6, %vm2331_vm3  ;;  %vm168_vm12 = vcmp.ge.s32.totalorder %v164_v7, 0  ;;  %vm2336_vm3 = vcmp.ge.s32.totalorder %v1715_v37, 0 }
  0xb7   :  { %v415_v10 = vsel %vm1885_vm15, %v407_v8, 0.0  ;;  %v416_v11 = vsel %vm1895_vm2, %v408_v9, 0.0  ;;  %1367 = vmatpush1.bf16.msra.mxu1 %v1366_v1  ;;  %v2333_v27 = vsel %vm1915_vm8, 4294967295, %v2332_v27  ;;  %vm172_vm15 = vcmp.lt.s32.totalorder %v164_v7, 16  ;;  %vm1930_vm2 = vmand %vm1907_vm14, %vm2336_vm3 }
  0xb8   :  { %v423_v17 = vrot.slane %v415_v10, 4  ;;  %v424_v18 = vrot.slane %v416_v11, 4  ;;  %v2338_v39 = vsel %vm1930_vm2, 4294967295, %v2337_v39  ;;  %v2343_v2 = vmov 0 }
  0xb9   :  { %v483_v47 = vpop.permute.xlu1 %482  ;;  %v442_v29 = vpop.permute.xlu0 %441  ;;  %vm2346_vm3 = vcmp.lt.s32.totalorder %v1689_v23, 16  ;;  %v559_v9 = vld [vmem:[#allocation3 + $0x40] sm:$0xff]  ;;  %v2350_v11 = vmov 0 }
  0xba   :  { %431 = vst [vmem:[#allocation3 + $0x50] sm:$0xf0] %v423_v17  ;;  %432 = vst [vmem:[#allocation3 + $0x58] sm:$0xf0] %v424_v18  ;;  %v489_v33 = vsel %vm2334_vm7, %v1794_v44, %v483_v47  ;;  %v452_v34 = vsel %vm2335_vm0, %v442_v29, %v444_v52 }
  0xbb   :  { %v497_v50 = vsel %vm1907_vm14, %v489_v33, 0.0  ;;  %v460_v38 = vsel %vm1915_vm8, %v452_v34, 0.0  ;;  %v564_v53 = vld [vmem:[#allocation3 + $0x68] sm:$0xff]  ;;  %vm1934_vm7 = vmand %vm168_vm12, %vm172_vm15  ;;  %vm2341_vm8 = vcmask 916480   ;;  %vm2342_vm15 = vcmp.ge.s32.totalorder %v1719_v40, 0 }
  0xbc   :  { %v505_v24 = vrot.slane %v497_v50, 4  ;;  %464 = vst [vmem:[#allocation3 + $0x60] sm:$0xf] %v460_v38  ;;  %v1360_v52 = vpack.c.bf16 %v564_v53, %v560_v46  ;;  %vm1948_vm12 = vmand %vm1934_vm7, %vm2342_vm15  ;;  %v2347_v40 = vmov 0  ;;  %vm2251_vm15 = vcmask 908288  }
  0xbd   :  { %v448_v32 = vpop.permute.xlu1 %447  ;;  %v485_v56 = vpop.permute.xlu0 %484  ;;  %v2344_v2 = vsel %vm1948_vm12, 4294967295, %v2343_v2  ;;  %v1142_v50 = vld [vmem:[%s2212_s5] sm:$0xf] }
  0xbe   :  { %513 = vst [vmem:[#allocation3 + $0x70] sm:$0xf0] %v505_v24  ;;  %v454_v37 = vsel %vm2335_vm0, %v446_v28, %v448_v32  ;;  %v490_v26 = vsel %vm2341_vm8, %v483_v47, %v485_v56  ;;  %1361 = vmatprep.subr.bf16.mxu0 %v1360_v52  ;;  %vm2345_vm8 = vmmov %vm2335_vm0 }
  0xbf   :  { %v462_v59 = vsel %vm1930_vm2, %v454_v37, 0.0  ;;  %v498_v63 = vsel %vm1934_vm7, %v490_v26, 0.0  ;;  %vm1959_vm0 = vmand %vm1853_vm6, %vm2346_vm3  ;;  %vm2349_vm2 = vcmp.lt.s32.totalorder %v1635_v58, 16  ;;  %vm2352_vm3 = vcmp.lt.s32.totalorder %v1792_v43, 16 }
  0xc0   :  { %466 = vst [vmem:[#allocation3 + $0x70] sm:$0xf] %v462_v59  ;;  %v506_v1 = vrot.slane %v498_v63, 4  ;;  %v2348_v40 = vsel %vm1959_vm0, 4294967295, %v2347_v40  ;;  %v550_v63 = vld [vmem:[%s2208_s1] sm:$0xf] }
  0xc1   :  { %v526_v28 = vpop.permute.xlu1 %525  ;;  %v450_v6 = vpop.permute.xlu0 %449  ;;  %v561_v26 = vld [vmem:[#allocation3 + $0x50] sm:$0xff] }
  0xc2   :  { %514 = vst [vmem:[#allocation3 + $0x78] sm:$0xf0] %v506_v1  ;;  %v455_v7 = vsel %vm2345_vm8, %v448_v32, %v450_v6  ;;  %vm1967_vm8 = vmand %vm1786_vm9, %vm2349_vm2 }
  0xc3   :  { %v463_v8 = vsel %vm1948_vm12, %v455_v7, 0.0  ;;  %v563_v10 = vld [vmem:[#allocation3 + $0x60] sm:$0xff]  ;;  %v2351_v11 = vsel %vm1967_vm8, 4294967295, %v2350_v11  ;;  %vm1981_vm2 = vmand %vm1907_vm14, %vm2352_vm3  ;;  %vm2355_vm12 = vcmp.lt.s32.totalorder %v1798_v49, 16  ;;  %v562_v49 = vld [vmem:[#allocation3 + $0x58] sm:$0xff]  ;;  %vm2365_vm3 = vnez %v2269_v0 }
  0xc4   :  { %467 = vst [vmem:[#allocation3 + $0x78] sm:$0xf] %v463_v8  ;;  %v1362_v17 = vpack.c.bf16 %v563_v10, %v559_v9 }
  0xc5   :  { %v524_v23 = vpop.permute.xlu1 %523  ;;  %v528_v18 = vpop.permute.xlu0 %527 }
  0xc6   :  { %v534_v47 = vsel %vm2251_vm15, %v524_v23, %v526_v28  ;;  %v535_v29 = vsel %vm2251_vm15, %v526_v28, %v528_v18  ;;  %1363 = vmatpush1.bf16.msra.mxu0 %v1362_v17  ;;  %vm1989_vm15 = vmand %vm1934_vm7, %vm2355_vm12  ;;  %vm581_vm12 = vcmask 1043456  }
  0xc7   :  { %v542_v33 = vsel %vm1959_vm0, %v534_v47, 0.0  ;;  %v543_v58 = vsel %vm1967_vm8, %v535_v29, 0.0  ;;  %vm2358_vm0 = vcmask 908288   ;;  %v565_v24 = vld [vmem:[#allocation3 + $0x70] sm:$0xff] }
  0xc8   :  { %546 = vst [vmem:[#allocation3 + $0x80] sm:$0xf] %v542_v33  ;;  %547 = vst [vmem:[#allocation3 + $0x88] sm:$0xf] %v543_v58  ;;  %v1370_v59 = vpack.c.bf16 %v565_v24, %v561_v26 }
  0xc9   :  { %v532_v38 = vpop.permute.xlu1 %531  ;;  %v530_v46 = vpop.permute.xlu0 %529  ;;  %vm2359_vm8 = vmmov %vm2358_vm0 }
  0xca   :  { %v536_v43 = vsel %vm2358_vm0, %v528_v18, %v530_v46  ;;  %v537_v53 = vsel %vm2359_vm8, %v530_v46, %v532_v38  ;;  %vm577_vm0 = vcmask 293888   ;;  %vm2364_vm8 = vnez %v2267_v61 }
  0xcb   :  { %v544_v52 = vsel %vm1981_vm2, %v536_v43, 0.0  ;;  %v545_v32 = vsel %vm1989_vm15, %v537_v53, 0.0  ;;  %v566_v56 = vld [vmem:[#allocation3 + $0x78] sm:$0xff] }
  0xcc   :  { %548 = vst [vmem:[#allocation3 + $0x90] sm:$0xf] %v544_v52  ;;  %549 = vst [vmem:[#allocation3 + $0x98] sm:$0xf] %v545_v32  ;;  %v1368_v37 = vpack.c.bf16 %v566_v56, %v562_v49 }
  0xce   :  { %1369 = vmatprep.subr.bf16.mxu1 %v1368_v37 }
  0xcf   :  { %1371 = vmatpush1.bf16.msra.mxu1 %v1370_v59  ;;  %v568_v1 = vld [vmem:[#allocation3 + $0x88] sm:$0xf]  ;;  %v567_v28 = vld [vmem:[#allocation3 + $0x80] sm:$0xf] }
  0xd0   :  { %1344 = vmatprep.subr.msk.mxu0 %vm581_vm12, %v568_v1 }
  0xd1   :  { %1345 = vmatpush1.msk.msra.mxu0 %vm581_vm12, %v567_v28 }
  0xd2   :  { %1346 = vmatmul.mubr.msk.f32.vlgmr.msra.gmra.mrb[0].mxu0 %vm577_vm0, %v550_v63 }
  0xd3   :  { %v570_v6 = vld [vmem:[#allocation3 + $0x98] sm:$0xf]  ;;  %v569_v7 = vld [vmem:[#allocation3 + $0x90] sm:$0xf]  ;;  %1248 = vmatprep.mubr.f32.mxu0 %v1410_v3 }
  0xd4   :  { %1347 = vmatprep.subr.msk.mxu1 %vm581_vm12, %v570_v6 }
  0xd5   :  { %1348 = vmatpush1.msk.msra.mxu1 %vm581_vm12, %v569_v7  ;;  %v762_v7 = vld [vmem:[%s2209_s3] sm:$0xf] }
  0xd6   :  { %1349 = vmatmul.mubr.msk.f32.vlgmr.msra.gmra.mrb[0].mxu1 %vm577_vm0, %v550_v63 }
  0xd7   :  { %1319 = vmatprep.mubr.f32.mxu1 %v1410_v3 }
  0xda   :  { %v575_v8 = vpop.permute.xlu0 %574 }
 0x1a5   :  { %v660_v9 = vpop.f32.mrb[0].mxu0 }
 0x1a6   :  { %v662_v10 = vpop.f32.mrb[1].mxu0  ;;  %v661_v17 = vadd.f32 %v660_v9, %v575_v8  ;;  %v984_v9 = vld [vmem:[#allocation2 + $0x14] sm:$0xf] }
 0x1a7   :  { %v663_v23 = vadd.f32 %v662_v10, %v575_v8  ;;  %v1064_v10 = vld [vmem:[#allocation2 + $0x14] sm:$0xf] }
 0x1a8   :  { %v736_v18 = vsel %vm581_vm12, %v661_v17, 0.0  ;;  %v746_v47 = vmul.f32 %v661_v17, %v661_v17 }
 0x1a9   :  { %v731_v29 = vpop.f32.mrb[0].mxu1  ;;  %v737_v33 = vsel %vm581_vm12, %v663_v23, 0.0  ;;  %v747_v58 = vmul.f32 %v663_v23, %v663_v23 }
 0x1aa   :  { %v732_v38 = vadd.f32 %v731_v29, %v575_v8  ;;  %v733_v46 = vpop.f32.mrb[1].mxu1  ;;  %v738_v43 = vadd.f32 %v737_v33, %v736_v18  ;;  %v750_v53 = vsel %vm581_vm12, %v746_v47, 0.0 }
 0x1ab   :  { %v734_v24 = vadd.f32 %v733_v46, %v575_v8  ;;  %v751_v3 = vsel %vm581_vm12, %v747_v58, 0.0  ;;  %v782_v8 = vld [vmem:[%s2210_s4] sm:$0xf] }
 0x1ac   :  { %v748_v52 = vmul.f32 %v732_v38, %v732_v38  ;;  %v739_v32 = vsel %vm581_vm12, %v732_v38, 0.0  ;;  %v752_v49 = vadd.f32 %v751_v3, %v750_v53 }
 0x1ad   :  { %v740_v56 = vadd.f32 %v739_v32, %v738_v43  ;;  %v741_v37 = vsel %vm581_vm12, %v734_v24, 0.0  ;;  %v749_v26 = vmul.f32 %v734_v24, %v734_v24 }
 0x1ae   :  { %v753_v59 = vsel %vm581_vm12, %v748_v52, 0.0 }
 0x1af   :  { %v742_v63 = vadd.f32 %v741_v37, %v740_v56  ;;  %v754_v1 = vadd.f32 %v753_v59, %v752_v49  ;;  %v755_v28 = vsel %vm581_vm12, %v749_v26, 0.0 }
 0x1b1   :  { %743 = vadd.xlane.f32.xlu1 %v742_v63  ;;  %v756_v6 = vadd.f32 %v755_v28, %v754_v1 }
 0x1b3   :  { %757 = vadd.xlane.f32.xlu0 %v756_v6 }
 0x1c2   :  { %769 = vperm.xlu1 %1399, %v762_v7  }
 0x1c6   :  { %998 = vrot.lane.b32.xlu1 %v984_v9, %s1415_s15 }
 0x1c9   :  { %785 = vperm.xlu0 %1398, %v782_v8  }
 0x1ca   :  { %1078 = vrot.lane.b32.xlu1 %v1064_v10, %s1416_s16 }
 0x23e   :  { %v744_v18 = vpop.xlane.xlu1 %743 }
 0x23f   :  { %v745_v47 = vmul.f32 0.001953125, %v744_v18 }
 0x240   :  { %v758_v29 = vpop.xlane.xlu0 %757 }
 0x241   :  { %v759_v33 = vmul.f32 0.001953125, %v758_v29  ;;  %v760_v58 = vmul.f32 %v745_v47, %v745_v47  ;;  %v763_v53 = vsub.f32 %v661_v17, %v745_v47  ;;  %v764_v3 = vsub.f32 %v663_v23, %v745_v47 }
 0x242   :  { %v765_v52 = vsub.f32 %v732_v38, %v745_v47  ;;  %v766_v32 = vsub.f32 %v734_v24, %v745_v47  ;;  %v770_v49 = vpop.permute.xlu1 %769 }
 0x243   :  { %v761_v46 = vsub.f32 %v759_v33, %v760_v58  ;;  %v772_v56 = vmul.f32 %v770_v49, %v763_v53  ;;  %v773_v37 = vmul.f32 %v770_v49, %v764_v3 }
 0x244   :  { %v774_v26 = vmul.f32 %v770_v49, %v765_v52  ;;  %v775_v59 = vmul.f32 %v770_v49, %v766_v32 }
 0x245   :  { %v776_v43 = vadd.f32 1e-05, %v761_v46 }
 0x247   :  { %1406 = vrsqrt.f32 %v776_v43 }
 0x248   :  { %v786_v8 = vpop.permute.xlu0 %785 }
 0x251   :  { %v1407_v63 = vpop.eup %1406 }
 0x252   :  { %v778_v1 = vmul.f32 %v1407_v63, %v772_v56  ;;  %v779_v28 = vmul.f32 %v1407_v63, %v773_v37  ;;  %v780_v6 = vmul.f32 %v1407_v63, %v774_v26  ;;  %v781_v7 = vmul.f32 %v1407_v63, %v775_v59  ;;  %v1030_v26 = vld [vmem:[#allocation2 + $0x14] sm:$0xf]  ;;  %v1163_v63 = vld [vmem:[%s2211_s6] sm:$0xf] }
 0x253   :  { %v1110_v59 = vld [vmem:[#allocation2 + $0x14] sm:$0xf] }
 0x254   :  { %v788_v9 = vadd.f32 %v786_v8, %v778_v1  ;;  %v789_v10 = vadd.f32 %v786_v8, %v779_v28  ;;  %v790_v18 = vadd.f32 %v786_v8, %v780_v6  ;;  %v791_v29 = vadd.f32 %v786_v8, %v781_v7  ;;  %v2075_v1 = vpop.permute.xlu1 %998 }
 0x256   :  { %v792_v33 = vmax.f32 %v788_v9, 0.0  ;;  %v793_v17 = vmax.f32 %v789_v10, 0.0  ;;  %v794_v23 = vmax.f32 %v790_v18, 0.0  ;;  %v795_v38 = vmax.f32 %v791_v29, 0.0 }
 0x258   :  { %v800_v24 = vcombine.low %v792_v33, %v793_v17  ;;  %v801_v47 = vcombine.low %v794_v23, %v795_v38  ;;  %v1408_v58 = vcombine.low %v793_v17, %v793_v17  ;;  %v1409_v46 = vcombine.low %v795_v38, %v795_v38  ;;  %v2077_v28 = vpop.permute.xlu1 %1078 }
 0x25a   :  { %804 = vst [vmem:[#allocation2 + $0x4] sm:$0xff] %v800_v24  ;;  %805 = vst [vmem:[#allocation2 + $0xc] sm:$0xff] %v801_v47  ;;  %v974_v43 = vsel %vm1509_vm4, %v800_v24, 0.0  ;;  %v976_v53 = vsel %vm1553_vm10, %v801_v47, 0.0  ;;  %v975_v3 = vsel %vm1522_vm5, %v1408_v58, 0.0  ;;  %v977_v52 = vsel %vm1557_vm11, %v1409_v46, 0.0 }
 0x25b   :  { %978 = vst [vmem:[#allocation3 + $0x40] sm:$0xf] %v974_v43  ;;  %980 = vst [vmem:[#allocation3 + $0x50] sm:$0xf] %v976_v53  ;;  %vm2360_vm4 = vcmask 130048   ;;  %vm2362_vm10 = vcmask 7168  }
 0x25c   :  { %979 = vst [vmem:[#allocation3 + $0x48] sm:$0xf] %v975_v3  ;;  %981 = vst [vmem:[#allocation3 + $0x58] sm:$0xf] %v977_v52 }
 0x25d   :  { %vm2361_vm5 = vmmov %vm2360_vm4 }
 0x25e   :  { %vm2363_vm11 = vmmov %vm2362_vm10 }
 0x261   :  { %v841_v32 = vld [vmem:[#allocation2 + $0x8] sm:$0xff]  ;;  %v840_v49 = vld [vmem:[#allocation2] sm:$0xff]  ;;  %v842_v16 = vld [vmem:[#allocation2 + $0x10] sm:$0xf] }
 0x262   :  { %852 = vrot.lane.b32.xlu1 %v841_v32, %s1412_s13  ;;  %848 = vrot.lane.b32.xlu0 %v840_v49, %s1412_s13  ;;  %v922_v20 = vld [vmem:[#allocation2 + $0x10] sm:$0xf]  ;;  %v847_v30 = vcombine.high %v841_v32, %v841_v32  ;;  %v846_v31 = vcombine.high %v840_v49, %v840_v49 }
 0x263   :  { %v808_v56 = vld [vmem:[#allocation2 + $0x10] sm:$0xf] }
 0x264   :  { %v888_v37 = vld [vmem:[#allocation2 + $0x10] sm:$0xf] }
 0x266   :  { %856 = vrot.lane.b32.xlu1 %v842_v16, %s1412_s13  ;;  %814 = vrot.lane.b32.xlu0 %v840_v49, %s1413_s7 }
 0x26a   :  { %932 = vrot.lane.b32.xlu1 %v841_v32, %s1411_s12  ;;  %990 = vrot.lane.b32.xlu0 %v800_v24, %s1415_s15 }
 0x26e   :  { %936 = vrot.lane.b32.xlu1 %v922_v20, %s1411_s12  ;;  %1036 = vrot.lane.b32.xlu0 %v800_v24, %s1417_s17 }
 0x272   :  { %928 = vrot.lane.b32.xlu1 %v840_v49, %s1411_s12  ;;  %854 = vrot.lane.b32.xlu0 %v847_v30, %s1412_s13 }
 0x276   :  { %818 = vrot.lane.b32.xlu1 %v841_v32, %s1413_s7  ;;  %930 = vrot.lane.b32.xlu0 %v846_v31, %s1411_s12 }
 0x27a   :  { %822 = vrot.lane.b32.xlu1 %v808_v56, %s1413_s7  ;;  %934 = vrot.lane.b32.xlu0 %v847_v30, %s1411_s12 }
 0x27e   :  { %898 = vrot.lane.b32.xlu1 %v841_v32, %s1414_s14  ;;  %816 = vrot.lane.b32.xlu0 %v846_v31, %s1413_s7 }
 0x282   :  { %902 = vrot.lane.b32.xlu1 %v888_v37, %s1414_s14  ;;  %820 = vrot.lane.b32.xlu0 %v847_v30, %s1413_s7 }
 0x286   :  { %894 = vrot.lane.b32.xlu1 %v840_v49, %s1414_s14  ;;  %896 = vrot.lane.b32.xlu0 %v846_v31, %s1414_s14 }
 0x28a   :  { %994 = vrot.lane.b32.xlu1 %v801_v47, %s1415_s15  ;;  %900 = vrot.lane.b32.xlu0 %v847_v30, %s1414_s14 }
 0x28e   :  { %1074 = vrot.lane.b32.xlu1 %v801_v47, %s1416_s16  ;;  %992 = vrot.lane.b32.xlu0 %v1408_v58, %s1415_s15 }
 0x292   :  { %1070 = vrot.lane.b32.xlu1 %v800_v24, %s1416_s16  ;;  %996 = vrot.lane.b32.xlu0 %v1409_v46, %s1415_s15 }
 0x296   :  { %1040 = vrot.lane.b32.xlu1 %v801_v47, %s1417_s17  ;;  %1072 = vrot.lane.b32.xlu0 %v1408_v58, %s1416_s16 }
 0x29a   :  { %850 = vrot.lane.b32.xlu1 %v846_v31, %s1412_s13  ;;  %1076 = vrot.lane.b32.xlu0 %v1409_v46, %s1416_s16 }
 0x29e   :  { %1044 = vrot.lane.b32.xlu1 %v1030_v26, %s1417_s17  ;;  %1038 = vrot.lane.b32.xlu0 %v1408_v58, %s1417_s17 }
 0x2a2   :  { %1118 = vrot.lane.b32.xlu1 %v1408_v58, %s1418_s18  ;;  %1042 = vrot.lane.b32.xlu0 %v1409_v46, %s1417_s17 }
 0x2a6   :  { %1122 = vrot.lane.b32.xlu1 %v1409_v46, %s1418_s18  ;;  %1120 = vrot.lane.b32.xlu0 %v801_v47, %s1418_s18 }
 0x2aa   :  { %1116 = vrot.lane.b32.xlu1 %v800_v24, %s1418_s18  ;;  %1124 = vrot.lane.b32.xlu0 %v1110_v59, %s1418_s18 }
 0x2ae   :  { %1166 = vperm.xlu0 %1398, %v1163_v63  }
 0x2d4   :  { %v2079_v6 = vpop.permute.xlu0 %848  ;;  %v2081_v7 = vpop.permute.xlu1 %852 }
 0x2d8   :  { %v815_v8 = vpop.permute.xlu0 %814  ;;  %v857_v9 = vpop.permute.xlu1 %856 }
 0x2dc   :  { %v2083_v10 = vpop.permute.xlu0 %990  ;;  %v933_v18 = vpop.permute.xlu1 %932 }
 0x2e0   :  { %v2085_v29 = vpop.permute.xlu0 %1036  ;;  %v937_v33 = vpop.permute.xlu1 %936 }
 0x2e4   :  { %v855_v17 = vpop.permute.xlu0 %854  ;;  %v929_v23 = vpop.permute.xlu1 %928 }
 0x2e5   :  { %v860_v38 = vsel %vm2360_vm4, %v2081_v7, %v855_v17  ;;  %v861_v24 = vsel %vm2361_vm5, %v855_v17, %v857_v9  ;;  %vm2368_vm4 = vnez %v2287_v62  ;;  %vm2369_vm5 = vnez %v2289_v5 }
 0x2e6   :  { %v868_v47 = vsel %vm1708_vm1, %v860_v38, 0.0  ;;  %v869_v58 = vsel %vm1736_vm13, %v861_v24, 0.0  ;;  %vm2366_vm1 = vmmov %vm2362_vm10 }
 0x2e7   :  { %v876_v46 = vrot.slane %v868_v47, 4  ;;  %v877_v43 = vrot.slane %v869_v58, 4  ;;  %vm2367_vm13 = vmmov %vm2366_vm1 }
 0x2e8   :  { %v931_v53 = vpop.permute.xlu0 %930  ;;  %v819_v3 = vpop.permute.xlu1 %818 }
 0x2e9   :  { %884 = vst [vmem:[#allocation3 + $0x10] sm:$0xf0] %v876_v46  ;;  %885 = vst [vmem:[#allocation3 + $0x18] sm:$0xf0] %v877_v43  ;;  %v938_v52 = vsel %vm2362_vm10, %v929_v23, %v931_v53  ;;  %v939_v32 = vsel %vm2363_vm11, %v931_v53, %v933_v18  ;;  %vm2370_vm10 = vcmask 138240  }
 0x2ea   :  { %v946_v49 = vsel %vm2364_vm8, %v938_v52, 0.0  ;;  %v947_v36 = vsel %vm2365_vm3, %v939_v32, 0.0  ;;  %vm2371_vm11 = vmmov %vm2370_vm10  ;;  %vm2372_vm8 = vnez %v2275_v35  ;;  %vm2373_vm3 = vnez %v2271_v4 }
 0x2eb   :  { %v954_v16 = vrot.slane %v946_v49, 4  ;;  %v955_v20 = vrot.slane %v947_v36, 4 }
 0x2ec   :  { %v935_v48 = vpop.permute.xlu0 %934  ;;  %v823_v30 = vpop.permute.xlu1 %822 }
 0x2ed   :  { %962 = vst [vmem:[#allocation3 + $0x20] sm:$0xf0] %v954_v16  ;;  %963 = vst [vmem:[#allocation3 + $0x28] sm:$0xf0] %v955_v20  ;;  %v940_v31 = vsel %vm2366_vm1, %v933_v18, %v935_v48  ;;  %v941_v56 = vsel %vm2367_vm13, %v935_v48, %v937_v33 }
 0x2ee   :  { %v948_v37 = vsel %vm2368_vm4, %v940_v31, 0.0  ;;  %v949_v61 = vsel %vm2369_vm5, %v941_v56, 0.0  ;;  %vm2374_vm1 = vmmov %vm2370_vm10  ;;  %vm2376_vm4 = vnez %v2299_v21  ;;  %vm2377_vm5 = vnez %v2302_v22 }
 0x2ef   :  { %v956_v26 = vrot.slane %v948_v37, 4  ;;  %v957_v59 = vrot.slane %v949_v61, 4  ;;  %vm2375_vm13 = vmmov %vm2374_vm1 }
 0x2f0   :  { %v817_v0 = vpop.permute.xlu0 %816  ;;  %v899_v63 = vpop.permute.xlu1 %898 }
 0x2f1   :  { %964 = vst [vmem:[#allocation3 + $0x30] sm:$0xf0] %v956_v26  ;;  %965 = vst [vmem:[#allocation3 + $0x38] sm:$0xf0] %v957_v59  ;;  %v824_v9 = vsel %vm2370_vm10, %v815_v8, %v817_v0  ;;  %v825_v17 = vsel %vm2371_vm11, %v817_v0, %v819_v3  ;;  %vm2378_vm10 = vcmask 121856  }
 0x2f2   :  { %v832_v18 = vsel %vm2372_vm8, %v824_v9, 0.0  ;;  %v833_v62 = vsel %vm2373_vm3, %v825_v17, 0.0  ;;  %vm2379_vm11 = vmmov %vm2378_vm10  ;;  %vm2380_vm8 = vnez %v2273_v19  ;;  %vm2381_vm3 = vnez %v2281_v45 }
 0x2f3   :  { %836 = vst [vmem:[#allocation3] sm:$0xf] %v832_v18  ;;  %837 = vst [vmem:[#allocation3 + $0x8] sm:$0xf] %v833_v62 }
 0x2f4   :  { %v821_v5 = vpop.permute.xlu0 %820  ;;  %v903_v33 = vpop.permute.xlu1 %902 }
 0x2f5   :  { %v826_v23 = vsel %vm2374_vm1, %v819_v3, %v821_v5  ;;  %v827_v38 = vsel %vm2375_vm13, %v821_v5, %v823_v30  ;;  %vm2382_vm1 = vmmov %vm2378_vm10 }
 0x2f6   :  { %v834_v24 = vsel %vm2376_vm4, %v826_v23, 0.0  ;;  %v835_v8 = vsel %vm2377_vm5, %v827_v38, 0.0  ;;  %vm2383_vm13 = vmmov %vm2382_vm1  ;;  %vm2384_vm4 = vnez %v2306_v13  ;;  %vm2385_vm5 = vnez %v2308_v57 }
 0x2f7   :  { %838 = vst [vmem:[#allocation3 + $0x10] sm:$0xf] %v834_v24  ;;  %839 = vst [vmem:[#allocation3 + $0x18] sm:$0xf] %v835_v8 }
 0x2f8   :  { %v897_v35 = vpop.permute.xlu0 %896  ;;  %v895_v47 = vpop.permute.xlu1 %894 }
 0x2f9   :  { %v905_v4 = vsel %vm2378_vm10, %v897_v35, %v899_v63  ;;  %v904_v58 = vsel %vm2379_vm11, %v895_v47, %v897_v35  ;;  %vm2386_vm10 = vcmask 1039360  }
 0x2fa   :  { %v913_v46 = vsel %vm2380_vm8, %v905_v4, 0.0  ;;  %v912_v43 = vsel %vm2381_vm3, %v904_v58, 0.0  ;;  %vm2387_vm11 = vmmov %vm2386_vm10  ;;  %vm2388_vm8 = vnez %v2315_v25  ;;  %vm2389_vm3 = vnez %v2294_v14 }
 0x2fb   :  { %917 = vst [vmem:[#allocation3 + $0x28] sm:$0xf] %v913_v46  ;;  %916 = vst [vmem:[#allocation3 + $0x20] sm:$0xf] %v912_v43 }
 0x2fc   :  { %v901_v21 = vpop.permute.xlu0 %900  ;;  %v995_v53 = vpop.permute.xlu1 %994 }
 0x2fd   :  { %v906_v22 = vsel %vm2382_vm1, %v899_v63, %v901_v21  ;;  %v907_v3 = vsel %vm2383_vm13, %v901_v21, %v903_v33  ;;  %vm2390_vm1 = vmmov %vm2386_vm10 }
 0x2fe   :  { %v914_v52 = vsel %vm2384_vm4, %v906_v22, 0.0  ;;  %v915_v32 = vsel %vm2385_vm5, %v907_v3, 0.0  ;;  %vm2391_vm13 = vmmov %vm2390_vm1  ;;  %vm2392_vm4 = vnez %v2323_v51  ;;  %vm2393_vm5 = vnez %v2326_v60  ;;  %v1145_v61 = vld [vmem:[#allocation3 + $0x10] sm:$0xff] }
 0x2ff   :  { %918 = vst [vmem:[#allocation3 + $0x30] sm:$0xf] %v914_v52  ;;  %919 = vst [vmem:[#allocation3 + $0x38] sm:$0xf] %v915_v32 }
 0x300   :  { %v993_v19 = vpop.permute.xlu0 %992  ;;  %v1075_v49 = vpop.permute.xlu1 %1074 }
 0x301   :  { %v1000_v45 = vsel %vm2386_vm10, %v2083_v10, %v993_v19  ;;  %v1001_v36 = vsel %vm2387_vm11, %v993_v19, %v995_v53  ;;  %v1146_v10 = vld [vmem:[#allocation3 + $0x18] sm:$0xff]  ;;  %vm2394_vm10 = vcmask 916480  }
 0x302   :  { %v1008_v16 = vsel %vm2388_vm8, %v1000_v45, 0.0  ;;  %v1009_v20 = vsel %vm2389_vm3, %v1001_v36, 0.0  ;;  %vm2395_vm11 = vmmov %vm2394_vm10  ;;  %v1147_v36 = vld [vmem:[#allocation3 + $0x20] sm:$0xff] }
 0x303   :  { %v1016_v13 = vrot.slane %v1008_v16, 4  ;;  %v1017_v48 = vrot.slane %v1009_v20, 4  ;;  %vm2396_vm8 = vmmov %vm2394_vm10 }
 0x304   :  { %v997_v30 = vpop.permute.xlu0 %996  ;;  %v1071_v57 = vpop.permute.xlu1 %1070  ;;  %vm2397_vm3 = vmmov %vm2396_vm8 }
 0x305   :  { %1024 = vst [vmem:[#allocation3 + $0x40] sm:$0xf0] %v1016_v13  ;;  %1025 = vst [vmem:[#allocation3 + $0x48] sm:$0xf0] %v1017_v48  ;;  %v1002_v31 = vsel %vm2390_vm1, %v995_v53, %v997_v30  ;;  %v1003_v56 = vsel %vm2391_vm13, %v997_v30, %v2075_v1  ;;  %vm2398_vm1 = vcmask 130048   ;;  %vm2401_vm13 = vnez %v2265_v55 }
 0x306   :  { %v1010_v37 = vsel %vm2392_vm4, %v1002_v31, 0.0  ;;  %v1011_v25 = vsel %vm2393_vm5, %v1003_v56, 0.0  ;;  %v1150_v14 = vld [vmem:[#allocation3 + $0x38] sm:$0xff]  ;;  %v1149_v26 = vld [vmem:[#allocation3 + $0x30] sm:$0xff]  ;;  %vm2404_vm4 = vnez %v2333_v27  ;;  %vm2405_vm5 = vnez %v2320_v42  ;;  %v1148_v27 = vld [vmem:[#allocation3 + $0x28] sm:$0xff] }
 0x307   :  { %v1018_v59 = vrot.slane %v1010_v37, 4  ;;  %v1019_v0 = vrot.slane %v1011_v25, 4  ;;  %v1380_v63 = vpack.c.bf16 %v1150_v14, %v1146_v10  ;;  %v1382_v9 = vpack.c.bf16 %v1149_v26, %v1145_v61 }
 0x308   :  { %v1073_v17 = vpop.permute.xlu0 %1072  ;;  %v1041_v18 = vpop.permute.xlu1 %1040 }
 0x309   :  { %1026 = vst [vmem:[#allocation3 + $0x50] sm:$0xf0] %v1018_v59  ;;  %1027 = vst [vmem:[#allocation3 + $0x58] sm:$0xf0] %v1019_v0  ;;  %v1080_v1 = vsel %vm2394_vm10, %v1071_v57, %v1073_v17  ;;  %v1081_v62 = vsel %vm2395_vm11, %v1073_v17, %v1075_v49  ;;  %1381 = vmatprep.subr.bf16.mxu1 %v1380_v63 }
 0x30a   :  { %v1088_v51 = vsel %vm1853_vm6, %v1080_v1, 0.0  ;;  %v1089_v60 = vsel %vm1786_vm9, %v1081_v62, 0.0  ;;  %1383 = vmatpush1.bf16.msra.mxu1 %v1382_v9  ;;  %vm2399_vm6 = vmmov %vm2398_vm1  ;;  %vm2400_vm9 = vnez %v2263_v54 }
 0x30b   :  { %v1096_v5 = vrot.slane %v1088_v51, 4  ;;  %v1097_v33 = vrot.slane %v1089_v60, 4 }
 0x30c   :  { %v1077_v23 = vpop.permute.xlu0 %1076  ;;  %v851_v38 = vpop.permute.xlu1 %850  ;;  %v1152_v30 = vld [vmem:[#allocation3 + $0x48] sm:$0xff] }
 0x30d   :  { %1104 = vst [vmem:[#allocation3 + $0x60] sm:$0xf0] %v1096_v5  ;;  %1105 = vst [vmem:[#allocation3 + $0x68] sm:$0xf0] %v1097_v33  ;;  %v1082_v24 = vsel %vm2396_vm8, %v1075_v49, %v1077_v23  ;;  %v1083_v8 = vsel %vm2397_vm3, %v1077_v23, %v2077_v28  ;;  %v858_v35 = vsel %vm2398_vm1, %v2079_v6, %v851_v38  ;;  %vm2408_vm8 = vnez %v2338_v39 }
 0x30e   :  { %v859_v12 = vsel %vm2399_vm6, %v851_v38, %v2081_v7  ;;  %v1090_v41 = vsel %vm1907_vm14, %v1082_v24, 0.0  ;;  %v1091_v47 = vsel %vm1934_vm7, %v1083_v8, 0.0  ;;  %v866_v4 = vsel %vm2400_vm9, %v858_v35, 0.0 }
 0x30f   :  { %v867_v58 = vsel %vm2401_vm13, %v859_v12, 0.0  ;;  %v1098_v46 = vrot.slane %v1090_v41, 4  ;;  %v1099_v28 = vrot.slane %v1091_v47, 4  ;;  %v874_v43 = vrot.slane %v866_v4, 4 }
 0x310   :  { %v875_v21 = vrot.slane %v867_v58, 4  ;;  %v1039_v6 = vpop.permute.xlu0 %1038  ;;  %v1045_v53 = vpop.permute.xlu1 %1044  ;;  %vm2402_vm14 = vcmask 924672   ;;  %vm2409_vm3 = vnez %v2344_v2  ;;  %vm2410_vm1 = vcmask 908288   ;;  %v1154_v61 = vld [vmem:[#allocation3 + $0x58] sm:$0xff]  ;;  %v1153_v63 = vld [vmem:[#allocation3 + $0x50] sm:$0xff] }
 0x311   :  { %1106 = vst [vmem:[#allocation3 + $0x70] sm:$0xf0] %v1098_v46  ;;  %1107 = vst [vmem:[#allocation3 + $0x78] sm:$0xf0] %v1099_v28  ;;  %v1046_v15 = vsel %vm2402_vm14, %v2085_v29, %v1039_v6  ;;  %vm2412_vm9 = vnez %v2351_v11  ;;  %v1151_v11 = vld [vmem:[#allocation3 + $0x40] sm:$0xff] }
 0x312   :  { %882 = vst [vmem:[#allocation3] sm:$0xf0] %v874_v43  ;;  %883 = vst [vmem:[#allocation3 + $0x8] sm:$0xf0] %v875_v21  ;;  %v1054_v54 = vsel %vm2404_vm4, %v1046_v15, 0.0 }
 0x313   :  { %vm2403_vm7 = vmmov %vm2402_vm14  ;;  %1058 = vst [vmem:[#allocation3 + $0x60] sm:$0xf] %v1054_v54 }
 0x314   :  { %v1047_v44 = vsel %vm2403_vm7, %v1039_v6, %v1041_v18  ;;  %v1043_v7 = vpop.permute.xlu0 %1042  ;;  %v1119_v22 = vpop.permute.xlu1 %1118  ;;  %vm2406_vm10 = vmmov %vm2403_vm7 }
 0x315   :  { %v1055_v55 = vsel %vm2405_vm5, %v1047_v44, 0.0  ;;  %v1048_v3 = vsel %vm2406_vm10, %v1041_v18, %v1043_v7  ;;  %vm2407_vm11 = vmmov %vm2403_vm7 }
 0x316   :  { %1059 = vst [vmem:[#allocation3 + $0x68] sm:$0xf] %v1055_v55  ;;  %v1049_v52 = vsel %vm2407_vm11, %v1043_v7, %v1045_v53  ;;  %v1056_v32 = vsel %vm2408_vm8, %v1048_v3, 0.0  ;;  %vm2411_vm6 = vmmov %vm2410_vm1 }
 0x317   :  { %v1057_v29 = vsel %vm2409_vm3, %v1049_v52, 0.0  ;;  %1060 = vst [vmem:[#allocation3 + $0x70] sm:$0xf] %v1056_v32  ;;  %vm2413_vm13 = vmmov %vm2410_vm1 }
 0x318   :  { %1061 = vst [vmem:[#allocation3 + $0x78] sm:$0xf] %v1057_v29  ;;  %v1121_v19 = vpop.permute.xlu0 %1120  ;;  %v1123_v42 = vpop.permute.xlu1 %1122  ;;  %vm2414_vm14 = vmmov %vm2410_vm1 }
 0x319   :  { %v1144_v49 = vld [vmem:[#allocation3 + $0x8] sm:$0xff]  ;;  %v1143_v45 = vld [vmem:[#allocation3] sm:$0xff]  ;;  %v1127_v16 = vsel %vm2410_vm1, %v1119_v22, %v1121_v19  ;;  %v1128_v20 = vsel %vm2411_vm6, %v1121_v19, %v1123_v42 }
 0x31a   :  { %v1372_v13 = vpack.c.bf16 %v1148_v27, %v1144_v49  ;;  %v1374_v48 = vpack.c.bf16 %v1147_v36, %v1143_v45  ;;  %v1135_v39 = vsel %vm2412_vm9, %v1127_v16, 0.0  ;;  %v1136_v2 = vsel %vm1981_vm2, %v1128_v20, 0.0  ;;  %v1155_v56 = vld [vmem:[#allocation3 + $0x60] sm:$0xff] }
 0x31b   :  { %1139 = vst [vmem:[#allocation3 + $0x88] sm:$0xf] %v1135_v39  ;;  %1140 = vst [vmem:[#allocation3 + $0x90] sm:$0xf] %v1136_v2  ;;  %vm2415_vm2 = vnez %v2348_v40  ;;  %v1378_v59 = vpack.c.bf16 %v1155_v56, %v1151_v11 }
 0x31c   :  { %1373 = vmatprep.subr.bf16.mxu0 %v1372_v13  ;;  %v1125_v10 = vpop.permute.xlu0 %1124  ;;  %v1117_v37 = vpop.permute.xlu1 %1116 }
 0x31d   :  { %v1156_v57 = vld [vmem:[#allocation3 + $0x68] sm:$0xff]  ;;  %1375 = vmatpush1.bf16.msra.mxu0 %v1374_v48  ;;  %v1129_v25 = vsel %vm2413_vm13, %v1123_v42, %v1125_v10  ;;  %v1126_v14 = vsel %vm2414_vm14, %v1117_v37, %v1119_v22 }
 0x31e   :  { %v1376_v31 = vpack.c.bf16 %v1156_v57, %v1152_v30  ;;  %v1137_v34 = vsel %vm1989_vm15, %v1129_v25, 0.0  ;;  %v1134_v26 = vsel %vm2415_vm2, %v1126_v14, 0.0  ;;  %v1157_v9 = vld [vmem:[#allocation3 + $0x70] sm:$0xff] }
 0x31f   :  { %v1158_v0 = vld [vmem:[#allocation3 + $0x78] sm:$0xff]  ;;  %1141 = vst [vmem:[#allocation3 + $0x98] sm:$0xf] %v1137_v34  ;;  %1138 = vst [vmem:[#allocation3 + $0x80] sm:$0xf] %v1134_v26  ;;  %v1386_v18 = vpack.c.bf16 %v1157_v9, %v1153_v63 }
 0x320   :  { %1377 = vmatprep.subr.bf16.mxu0 %v1376_v31  ;;  %v1384_v17 = vpack.c.bf16 %v1158_v0, %v1154_v61 }
 0x321   :  { %1379 = vmatpush1.bf16.msra.mxu0 %v1378_v59 }
 0x322   :  { %1385 = vmatprep.subr.bf16.mxu1 %v1384_v17  ;;  %v1160_v1 = vld [vmem:[#allocation3 + $0x88] sm:$0xf]  ;;  %v1161_v51 = vld [vmem:[#allocation3 + $0x90] sm:$0xf] }
 0x323   :  { %1387 = vmatpush1.bf16.msra.mxu1 %v1386_v18  ;;  %1350 = vmatprep.subr.msk.mxu0 %vm581_vm12, %v1160_v1 }
 0x326   :  { %v1159_v40 = vld [vmem:[#allocation3 + $0x80] sm:$0xf]  ;;  %v1162_v62 = vld [vmem:[#allocation3 + $0x98] sm:$0xf] }
 0x327   :  { %1351 = vmatpush1.msk.msra.mxu0 %vm581_vm12, %v1159_v40  ;;  %1353 = vmatprep.subr.msk.mxu1 %vm581_vm12, %v1162_v62 }
 0x328   :  { %1352 = vmatmul.mubr.msk.f32.vlgmr.msra.gmra.mrb[2].mxu0 %vm577_vm0, %v1142_v50  ;;  %1354 = vmatpush1.msk.msra.mxu1 %vm581_vm12, %v1161_v51 }
 0x329   :  { %1355 = vmatmul.mubr.msk.f32.vlgmr.msra.gmra.mrb[2].mxu1 %vm577_vm0, %v1142_v50 }
 0x32d   :  { %v1167_v60 = vpop.permute.xlu0 %1166 }
 0x3fb   :  { %v1250_v5 = vpop.f32.mrb[2].mxu0 }
 0x3fc   :  { %v1251_v33 = vadd.f32 %v1250_v5, %v1167_v60  ;;  %v1252_v23 = vpop.f32.mrb[3].mxu0  ;;  %v1321_v38 = vpop.f32.mrb[2].mxu1 }
 0x3fd   :  { %v1253_v24 = vadd.f32 %v1252_v23, %v1167_v60  ;;  %v1322_v8 = vadd.f32 %v1321_v38, %v1167_v60  ;;  %v1323_v35 = vpop.f32.mrb[3].mxu1 }
 0x3fe   :  { %v1324_v12 = vadd.f32 %v1323_v35, %v1167_v60 }
 0x3ff   :  { %v1330_v41 = vcombine.low %v1251_v33, %v1253_v24 }
 0x400   :  { %v1331_v47 = vcombine.low %v1322_v8, %v1324_v12 }
 0x401   :  { %1334 = vst [vmem:[%s2213_s8] sm:$0xff] %v1330_v41 }
 0x402   :  { %1335 = vst [vmem:[%s2213_s8 + $0x8] sm:$0xff] %v1331_v47 }

</bundles_post_ra>
